<compile_context>
chip_gen: v5e
topology: v5e:2x2
jax: 0.10.0
libtpu: 0.0.40
codegen_flags: <defaults>
</compile_context>

<pallas_src>
import jax
import jax.numpy as jnp
from jax import lax
from jax.experimental import pallas as pl
from jax.experimental.pallas import tpu as pltpu

_LANE = 128      # lane-dense output tiles (unmasked vst)
_SUBLANE = 16    # bf16-friendly sublane multiple for batch tiles


def _flipout_kernel(x_ref, w_ref, logvar_ref, eps_ref,
                    sign_in_ref, sign_out_ref, bias_ref, out_ref,
                    w_bf_ref, w_pert_ref):
    # Hoist: the perturbed weight (and bf16 cast of W) depend only on the OUT
    # tile (grid axis 0).  Batch (grid axis 1) is the inner "arbitrary" axis,
    # so every core sees batch_id == 0 at the start of each OUT tile it owns
    # -> recompute exactly once per OUT tile.  NOTE: this guard is only valid
    # while the grid order stays (OUT outer/parallel, batch inner/arbitrary).
    @pl.when(pl.program_id(1) == 0)
    def _():
        w = w_ref[...]                                            # [TO, IN] f32
        w_bf_ref[...] = w.astype(jnp.bfloat16)
        w_pert = (w * jnp.exp(logvar_ref[...] * 0.5)
                  * eps_ref[...].astype(jnp.float32))
        w_pert_ref[...] = w_pert.astype(jnp.bfloat16)

    # bf16 activation path: cast x once, do the Rademacher multiply in bf16
    # (+/-1 is exact in bf16) -> roughly half the VPU work vs f32 mul + pack.
    x_bf = x_ref[...].astype(jnp.bfloat16)                        # [TB, IN]
    xs_bf = x_bf * sign_in_ref[...]                               # bf16 * bf16

    # NT contraction: both operands contract on IN -> the [OUT, IN] layout
    # feeds the MXU directly, no per-batch-step transpose of the weight tiles.
    # TODO(synk): confirm via pl.lower_as_mlir that no per-step XLU transpose
    #             is emitted; if it is, store the hoisted scratches as
    #             [IN, tile_out] once in the pl.when block instead.
    dn = (((1,), (1,)), ((), ()))

    acc = lax.dot_general(x_bf, w_bf_ref[...], dn,
                          preferred_element_type=jnp.float32)     # [TB, TO]
    acc = acc + lax.dot_general(xs_bf, w_pert_ref[...], dn,
                                preferred_element_type=jnp.float32
                                ) * sign_out_ref[...].astype(jnp.float32)
    acc = acc + bias_ref[...]
    out_ref[...] = acc.astype(out_ref.dtype)


def _vmem_budget_bytes():
    """~85% of this chip's physical VMEM (v5e/v6e: 128 MiB, v7x: 64 MiB/TC)."""
    try:
        cap = pltpu.get_tpu_info().vmem_capacity_bytes
    except Exception:
        cap = 64 << 20          # conservative: assume the smallest (v7x per-TC)
    return int(cap * 0.85)


def _vmem_footprint_bytes(tile_b, tile_out, in_dim):
    """Estimated VMEM use, including in-kernel temporaries.

    Weight/logvar/eps are counted double-buffered even though the kernel asks
    for pl.Buffered(1) on them -> conservative headroom (also covers the
    fallback path without single-buffering).
    """
    f32, bf16 = 4, 2
    blocks = (
        2 * tile_b * in_dim * f32             # x
        + 2 * tile_out * in_dim * f32         # weight
        + 2 * tile_out * in_dim * f32         # weight_logvar
        + 2 * tile_out * in_dim * bf16        # eps (bf16)
        + 2 * tile_b * in_dim * bf16          # sign_in (bf16)
        + 2 * tile_b * tile_out * bf16        # sign_out (bf16)
        + 2 * tile_out * f32                  # bias
        + 2 * tile_b * tile_out * f32         # out
    )
    scratch = 2 * tile_out * in_dim * bf16    # hoisted bf16 W and W_pert
    temps = (
        2 * tile_out * in_dim * f32           # f32 exp(logvar/2) / W_pert temps
        + 2 * tile_b * in_dim * bf16          # x_bf, xs_bf
        + tile_b * tile_out * f32             # f32 accumulator
    )
    return blocks + scratch + temps


def _pick_tiles(B, IN, OUT, tile_b, tile_out, budget):
    if tile_out is None:
        if OUT % _LANE == 0:
            # Prefer >= 2 OUT tiles so the "parallel" axis can shard across
            # v7x's two TensorCores (keeps the hoist guard on the batch axis
            # valid); otherwise fall back to a single full-OUT tile.
            if OUT % 256 == 0 and OUT // 256 >= 2:
                tile_out = 256
            elif OUT // _LANE >= 2:
                tile_out = _LANE
            else:
                tile_out = OUT
        else:
            # TODO(synk): pad OUT up to a multiple of 128 for lane-dense
            #             (unmasked) stores instead of a full-OUT tile.
            tile_out = OUT
    if tile_b is None:
        if B <= 512:
            tile_b = B                       # skip batch tiling entirely
        else:
            tile_b = next((t for t in (512, 256, 128, 64, 32, 16)
                           if B % t == 0), B)
    # Shrink until the estimated VMEM footprint fits the per-chip budget
    # (prefer shrinking tile_out: the once-per-OUT-tile hoist stays valid).
    while _vmem_footprint_bytes(tile_b, tile_out, IN) > budget:
        if (tile_out > _LANE and tile_out % 2 == 0
                and (tile_out // 2) % _LANE == 0 and OUT % (tile_out // 2) == 0):
            tile_out //= 2
        elif (tile_b > _SUBLANE and tile_b % 2 == 0
                and (tile_b // 2) % _SUBLANE == 0 and B % (tile_b // 2) == 0):
            tile_b //= 2
        else:
            break
    return tile_b, tile_out


def variational_flipout_forward(x, weight, weight_logvar, bias,
                                eps, sign_in, sign_out, *,
                                tile_b=None, tile_out=None):
    B, IN = x.shape
    OUT, IN_w = weight.shape
    assert IN_w == IN, "weight must be [OUT, IN] (PyTorch Linear layout)"

    # Ship the stochastic side inputs as bf16: +/-1 signs are exact in bf16;
    # bf16 eps only perturbs the (already random) noise term.  This halves
    # their HBM streams and VMEM blocks.
    eps = eps.astype(jnp.bfloat16)
    sign_in = sign_in.astype(jnp.bfloat16)
    sign_out = sign_out.astype(jnp.bfloat16)
    weight = weight.astype(jnp.float32)
    weight_logvar = weight_logvar.astype(jnp.float32)
    bias2d = bias.astype(jnp.float32).reshape(1, OUT)

    budget = _vmem_budget_bytes()
    tile_b, tile_out = _pick_tiles(B, IN, OUT, tile_b, tile_out, budget)

    assert B % tile_b == 0, "B must be divisible by tile_b"
    assert tile_b == B or tile_b % _SUBLANE == 0, \
        "tile_b must be a multiple of 16 (bf16 sublane) or equal B"
    assert OUT % tile_out == 0, "OUT must be divisible by tile_out"
    assert tile_out == OUT or tile_out % _LANE == 0, \
        "tile_out must be a multiple of 128 (lane-dense output) or equal OUT"

    n_out, n_b = OUT // tile_out, B // tile_b
    grid = (n_out, n_b)

    footprint = _vmem_footprint_bytes(tile_b, tile_out, IN)
    # Never exceed ~85% of physical VMEM (v7x only has 64 MiB per core).
    vmem_limit = max(min(int(footprint * 1.4) + (4 << 20), budget), 16 << 20)

    cost = pl.CostEstimate(
        flops=4 * B * IN * OUT,                        # two bf16 matmuls
        transcendentals=OUT * IN,                      # exp(logvar/2), once
        bytes_accessed=int(
            n_out * B * IN * (4 + 2)                   # x + sign_in per OUT tile
            + OUT * IN * (4 + 4 + 2)                   # weight + logvar + eps
            + B * OUT * (2 + 4)                        # sign_out + output
            + OUT * 4),                                # bias
    )
    # NOTE: when B*IN rivals OUT*IN (huge batch), x/sign_in are re-streamed
    # n_out times; increasing tile_out (fewer n_out) trades VMEM for traffic.

    def make_call(single_buffer_weights):
        # weight / logvar / eps only change once per OUT tile -> single-buffer
        # them to cut the dominant VMEM term; the one exposed fetch per OUT
        # tile is amortized over all n_b batch steps.
        w_kw = dict(pipeline_mode=pl.Buffered(1)) if single_buffer_weights else {}
        in_specs = [
            pl.BlockSpec((tile_b, IN),       lambda j, i: (i, 0)),           # x
            pl.BlockSpec((tile_out, IN),     lambda j, i: (j, 0), **w_kw),   # weight
            pl.BlockSpec((tile_out, IN),     lambda j, i: (j, 0), **w_kw),   # logvar
            pl.BlockSpec((tile_out, IN),     lambda j, i: (j, 0), **w_kw),   # eps
            pl.BlockSpec((tile_b, IN),       lambda j, i: (i, 0)),           # sign_in
            pl.BlockSpec((tile_b, tile_out), lambda j, i: (i, j)),           # sign_out
            pl.BlockSpec((1, tile_out),      lambda j, i: (0, j)),           # bias
        ]
        return pl.pallas_call(
            _flipout_kernel,
            out_shape=jax.ShapeDtypeStruct((B, OUT), x.dtype),
            grid_spec=pltpu.PrefetchScalarGridSpec(
                num_scalar_prefetch=0,
                grid=grid,
                in_specs=in_specs,
                out_specs=pl.BlockSpec((tile_b, tile_out), lambda j, i: (i, j)),
                scratch_shapes=[
                    pltpu.VMEM((tile_out, IN), jnp.bfloat16),   # hoisted bf16 W
                    pltpu.VMEM((tile_out, IN), jnp.bfloat16),   # hoisted bf16 W_pert
                ],
            ),
            compiler_params=pltpu.CompilerParams(
                dimension_semantics=("parallel", "arbitrary"),
                vmem_limit_bytes=vmem_limit,
            ),
            cost_estimate=cost,
        )

    args = (x, weight, weight_logvar, eps, sign_in, sign_out, bias2d)
    try:
        return make_call(True)(*args)
    except Exception:
        # pl.Buffered(1) rejected by this jax/libtpu build: fall back to the
        # default double-buffered pipeline (identical numerics, larger blocks).
        return make_call(False)(*args)


def reference_forward_bf16(x, weight, weight_logvar, bias, eps, sign_in, sign_out):
    """Reference matching the kernel's bf16-operand / f32-accumulate math."""
    w_bf = weight.astype(jnp.bfloat16)
    w_pert = weight * jnp.exp(weight_logvar * 0.5) * eps.astype(jnp.float32)
    w_pert_bf = w_pert.astype(jnp.bfloat16)
    x_bf = x.astype(jnp.bfloat16)
    xs_bf = x_bf * sign_in.astype(jnp.bfloat16)
    mean = jnp.dot(x_bf, w_bf.T, preferred_element_type=jnp.float32)
    noise = jnp.dot(xs_bf, w_pert_bf.T,
                    preferred_element_type=jnp.float32) * sign_out.astype(jnp.float32)
    return mean + noise + bias[None, :]


def reference_forward_f32(x, weight, weight_logvar, bias, eps, sign_in, sign_out):
    eps = eps.astype(jnp.float32)
    sign_in = sign_in.astype(jnp.float32)
    sign_out = sign_out.astype(jnp.float32)
    mean = x @ weight.T
    w_pert = weight * jnp.exp(weight_logvar * 0.5) * eps
    noise = ((x * sign_in) @ w_pert.T) * sign_out
    return mean + noise + bias[None, :]


if __name__ == "__main__":
    # Small but lane-aligned shapes (nn.Linear(128, 256)).
    B, IN, OUT = 32, 128, 256

    key = jax.random.PRNGKey(0)
    k_x, k_w, k_lv, k_b, k_eps, k_si, k_so = jax.random.split(key, 7)

    x = jax.random.normal(k_x, (B, IN), dtype=jnp.float32)

    # Deterministic parameter init (module init has logvar = log(1) = 0; use a
    # small random logvar to exercise the exp path as in a trained state).
    weight = jax.random.normal(k_w, (OUT, IN), dtype=jnp.float32) / jnp.sqrt(IN)
    weight_logvar = 0.1 * jax.random.normal(k_lv, (OUT, IN), dtype=jnp.float32)
    bias = 0.1 * jax.random.normal(k_b, (OUT,), dtype=jnp.float32)

    # Stochastic inputs, drawn once deterministically; shipped as bf16.
    eps = jax.random.normal(k_eps, (OUT, IN), dtype=jnp.float32).astype(jnp.bfloat16)
    sign_in = jnp.sign(jax.random.normal(k_si, (B, IN))).astype(jnp.bfloat16)
    sign_out = jnp.sign(jax.random.normal(k_so, (B, OUT))).astype(jnp.bfloat16)

    # 1) Default tile selection: B <= 512 -> no batch tiling; OUT split into
    #    two lane-dense 128-wide tiles (n_out >= 2 for v7x megacore).
    out_default = jax.block_until_ready(
        variational_flipout_forward(x, weight, weight_logvar, bias,
                                    eps, sign_in, sign_out))

    # 2) Explicit small tiles: exercises multiple batch steps per OUT tile and
    #    hence the once-per-OUT-tile W_pert hoist.
    out_tiled = jax.block_until_ready(
        variational_flipout_forward(x, weight, weight_logvar, bias,
                                    eps, sign_in, sign_out,
                                    tile_b=16, tile_out=128))

    ref_bf16 = reference_forward_bf16(x, weight, weight_logvar, bias,
                                      eps, sign_in, sign_out)
    ref_f32 = reference_forward_f32(x, weight, weight_logvar, bias,
                                    eps, sign_in, sign_out)

    for name, out in (("default", out_default), ("tiled", out_tiled)):
        assert jnp.allclose(out, ref_bf16, atol=2e-2, rtol=2e-2), \
            f"{name}: mismatch vs bf16-matched reference"
        assert jnp.allclose(out, ref_f32, atol=8e-2, rtol=8e-2), \
            f"{name}: mismatch vs f32 reference"

    print("KERNEL_OK")
</pallas_src>

<mosaic_0001>
module attributes {stable_mosaic.version = 11 : i64} {
  func.func @_flipout_kernel(%arg0: i32, %arg1: i32, %arg2: memref<32x128xf32, #tpu.memory_space<vmem>>, %arg3: memref<128x128xf32, #tpu.memory_space<vmem>>, %arg4: memref<128x128xf32, #tpu.memory_space<vmem>>, %arg5: memref<128x128xbf16, #tpu.memory_space<vmem>>, %arg6: memref<32x128xbf16, #tpu.memory_space<vmem>>, %arg7: memref<32x128xbf16, #tpu.memory_space<vmem>>, %arg8: memref<1x128xf32, #tpu.memory_space<vmem>>, %arg9: memref<32x128xf32, #tpu.memory_space<vmem>>, %arg10: memref<128x128xbf16, #tpu.memory_space<vmem>>, %arg11: memref<128x128xbf16, #tpu.memory_space<vmem>>) attributes {dimension_semantics = [#tpu.dimension_semantics<parallel>, #tpu.dimension_semantics<arbitrary>], iteration_bounds = array<i64: 2, 1>, scalar_prefetch = 0 : i64, scratch_operands = 2 : i64, tpu.core_type = #tpu.core_type<tc>, window_params = [{transform_indices = @transform_0, window_bounds = array<i64: 32, 128>}, {pipeline_mode = #tpu.pipeline_mode<synchronous>, transform_indices = @transform_1, window_bounds = array<i64: 128, 128>}, {pipeline_mode = #tpu.pipeline_mode<synchronous>, transform_indices = @transform_2, window_bounds = array<i64: 128, 128>}, {pipeline_mode = #tpu.pipeline_mode<synchronous>, transform_indices = @transform_3, window_bounds = array<i64: 128, 128>}, {transform_indices = @transform_4, window_bounds = array<i64: 32, 128>}, {transform_indices = @transform_5, window_bounds = array<i64: 32, 128>}, {transform_indices = @transform_6, window_bounds = array<i64: 1, 128>}, {transform_indices = @transform_7, window_bounds = array<i64: 32, 128>}]} {
    %c0_i32 = arith.constant 0 : i32
    %0 = arith.cmpi eq, %arg1, %c0_i32 : i32
    %1 = arith.extui %0 : i1 to i32
    %c0_i32_0 = arith.constant 0 : i32
    %2 = arith.cmpi ne, %1, %c0_i32_0 : i32
    scf.if %2 {
      %c0_15 = arith.constant 0 : index
      %c0_16 = arith.constant 0 : index
      %19 = vector.load %arg3[%c0_15, %c0_16] : memref<128x128xf32, #tpu.memory_space<vmem>>, vector<128x128xf32>
      %20 = arith.truncf %19 : vector<128x128xf32> to vector<128x128xbf16>
      %c0_17 = arith.constant 0 : index
      %c0_18 = arith.constant 0 : index
      %21 = vector.load %arg10[%c0_17, %c0_18] : memref<128x128xbf16, #tpu.memory_space<vmem>>, vector<128x128xbf16>
      tpu.vector_store %arg10[%c0_17, %c0_18], %20 {strides = array<i32>} : memref<128x128xbf16, #tpu.memory_space<vmem>>, vector<128x128xbf16>,
      %c0_19 = arith.constant 0 : index
      %c0_20 = arith.constant 0 : index
      %22 = vector.load %arg4[%c0_19, %c0_20] : memref<128x128xf32, #tpu.memory_space<vmem>>, vector<128x128xf32>
      %cst_21 = arith.constant 5.000000e-01 : f32
      %23 = vector.broadcast %cst_21 : f32 to vector<128x128xf32>
      %24 = arith.mulf %22, %23 : vector<128x128xf32>
      %25 = math.exp %24 : vector<128x128xf32>
      %26 = arith.mulf %19, %25 : vector<128x128xf32>
      %c0_22 = arith.constant 0 : index
      %c0_23 = arith.constant 0 : index
      %27 = vector.load %arg5[%c0_22, %c0_23] : memref<128x128xbf16, #tpu.memory_space<vmem>>, vector<128x128xbf16>
      %28 = arith.extf %27 : vector<128x128xbf16> to vector<128x128xf32>
      %29 = arith.mulf %26, %28 : vector<128x128xf32>
      %30 = arith.truncf %29 : vector<128x128xf32> to vector<128x128xbf16>
      %c0_24 = arith.constant 0 : index
      %c0_25 = arith.constant 0 : index
      %31 = vector.load %arg11[%c0_24, %c0_25] : memref<128x128xbf16, #tpu.memory_space<vmem>>, vector<128x128xbf16>
      tpu.vector_store %arg11[%c0_24, %c0_25], %30 {strides = array<i32>} : memref<128x128xbf16, #tpu.memory_space<vmem>>, vector<128x128xbf16>,
    } else {
    }
    %c0 = arith.constant 0 : index
    %c0_1 = arith.constant 0 : index
    %3 = vector.load %arg2[%c0, %c0_1] : memref<32x128xf32, #tpu.memory_space<vmem>>, vector<32x128xf32>
    %4 = arith.truncf %3 : vector<32x128xf32> to vector<32x128xbf16>
    %c0_2 = arith.constant 0 : index
    %c0_3 = arith.constant 0 : index
    %5 = vector.load %arg6[%c0_2, %c0_3] : memref<32x128xbf16, #tpu.memory_space<vmem>>, vector<32x128xbf16>
    %6 = arith.mulf %4, %5 : vector<32x128xbf16>
    %c0_4 = arith.constant 0 : index
    %c0_5 = arith.constant 0 : index
    %7 = vector.load %arg10[%c0_4, %c0_5] : memref<128x128xbf16, #tpu.memory_space<vmem>>, vector<128x128xbf16>
    %cst = arith.constant dense<0.000000e+00> : vector<32x128xf32>
    %8 = tpu.matmul %4, %7, %cst {dimension_numbers = #tpu.dot_dimension_numbers<[1], [1], [0], [0], [0, 0, 1, 0], [], []>} : vector<32x128xbf16>, vector<128x128xbf16>, vector<32x128xf32> -> vector<32x128xf32>
    %c0_6 = arith.constant 0 : index
    %c0_7 = arith.constant 0 : index
    %9 = vector.load %arg11[%c0_6, %c0_7] : memref<128x128xbf16, #tpu.memory_space<vmem>>, vector<128x128xbf16>
    %cst_8 = arith.constant dense<0.000000e+00> : vector<32x128xf32>
    %10 = tpu.matmul %6, %9, %cst_8 {dimension_numbers = #tpu.dot_dimension_numbers<[1], [1], [0], [0], [0, 0, 1, 0], [], []>} : vector<32x128xbf16>, vector<128x128xbf16>, vector<32x128xf32> -> vector<32x128xf32>
    %c0_9 = arith.constant 0 : index
    %c0_10 = arith.constant 0 : index
    %11 = vector.load %arg7[%c0_9, %c0_10] : memref<32x128xbf16, #tpu.memory_space<vmem>>, vector<32x128xbf16>
    %12 = arith.extf %11 : vector<32x128xbf16> to vector<32x128xf32>
    %13 = arith.mulf %10, %12 : vector<32x128xf32>
    %14 = arith.addf %8, %13 : vector<32x128xf32>
    %c0_11 = arith.constant 0 : index
    %c0_12 = arith.constant 0 : index
    %15 = vector.load %arg8[%c0_11, %c0_12] : memref<1x128xf32, #tpu.memory_space<vmem>>, vector<1x128xf32>
    %16 = vector.broadcast %15 : vector<1x128xf32> to vector<32x128xf32>
    %17 = arith.addf %14, %16 : vector<32x128xf32>
    %c0_13 = arith.constant 0 : index
    %c0_14 = arith.constant 0 : index
    %18 = vector.load %arg9[%c0_13, %c0_14] : memref<32x128xf32, #tpu.memory_space<vmem>>, vector<32x128xf32>
    tpu.vector_store %arg9[%c0_13, %c0_14], %17 {strides = array<i32>} : memref<32x128xf32, #tpu.memory_space<vmem>>, vector<32x128xf32>,
    return
  }
  func.func @transform_0(%arg0: i32, %arg1: i32) -> (i32, i32) {
    %c0_i32 = arith.constant 0 : i32
    %c0_i32_0 = arith.constant 0 : i32
    return %arg1, %c0_i32 : i32, i32
  }
  func.func @transform_1(%arg0: i32, %arg1: i32) -> (i32, i32) {
    %c0_i32 = arith.constant 0 : i32
    %c0_i32_0 = arith.constant 0 : i32
    return %arg0, %c0_i32 : i32, i32
  }
  func.func @transform_2(%arg0: i32, %arg1: i32) -> (i32, i32) {
    %c0_i32 = arith.constant 0 : i32
    %c0_i32_0 = arith.constant 0 : i32
    return %arg0, %c0_i32 : i32, i32
  }
  func.func @transform_3(%arg0: i32, %arg1: i32) -> (i32, i32) {
    %c0_i32 = arith.constant 0 : i32
    %c0_i32_0 = arith.constant 0 : i32
    return %arg0, %c0_i32 : i32, i32
  }
  func.func @transform_4(%arg0: i32, %arg1: i32) -> (i32, i32) {
    %c0_i32 = arith.constant 0 : i32
    %c0_i32_0 = arith.constant 0 : i32
    return %arg1, %c0_i32 : i32, i32
  }
  func.func @transform_5(%arg0: i32, %arg1: i32) -> (i32, i32) {
    %c0_i32 = arith.constant 0 : i32
    return %arg1, %arg0 : i32, i32
  }
  func.func @transform_6(%arg0: i32, %arg1: i32) -> (i32, i32) {
    %c0_i32 = arith.constant 0 : i32
    %c0_i32_0 = arith.constant 0 : i32
    return %c0_i32, %arg0 : i32, i32
  }
  func.func @transform_7(%arg0: i32, %arg1: i32) -> (i32, i32) {
    %c0_i32 = arith.constant 0 : i32
    return %arg1, %arg0 : i32, i32
  }
}

module attributes {stable_mosaic.version = 11 : i64} {
  func.func @_flipout_kernel(%arg0: i32, %arg1: i32, %arg2: memref<32x128xf32, #tpu.memory_space<vmem>>, %arg3: memref<128x128xf32, #tpu.memory_space<vmem>>, %arg4: memref<128x128xf32, #tpu.memory_space<vmem>>, %arg5: memref<128x128xbf16, #tpu.memory_space<vmem>>, %arg6: memref<32x128xbf16, #tpu.memory_space<vmem>>, %arg7: memref<32x128xbf16, #tpu.memory_space<vmem>>, %arg8: memref<1x128xf32, #tpu.memory_space<vmem>>, %arg9: memref<32x128xf32, #tpu.memory_space<vmem>>, %arg10: memref<128x128xbf16, #tpu.memory_space<vmem>>, %arg11: memref<128x128xbf16, #tpu.memory_space<vmem>>) attributes {dimension_semantics = [#tpu.dimension_semantics<parallel>, #tpu.dimension_semantics<arbitrary>], iteration_bounds = array<i64: 2, 1>, scalar_prefetch = 0 : i64, scratch_operands = 2 : i64, tpu.core_type = #tpu.core_type<tc>, window_params = [{transform_indices = @transform_0, window_bounds = array<i64: 32, 128>}, {transform_indices = @transform_1, window_bounds = array<i64: 128, 128>}, {transform_indices = @transform_2, window_bounds = array<i64: 128, 128>}, {transform_indices = @transform_3, window_bounds = array<i64: 128, 128>}, {transform_indices = @transform_4, window_bounds = array<i64: 32, 128>}, {transform_indices = @transform_5, window_bounds = array<i64: 32, 128>}, {transform_indices = @transform_6, window_bounds = array<i64: 1, 128>}, {transform_indices = @transform_7, window_bounds = array<i64: 32, 128>}]} {
    %c0_i32 = arith.constant 0 : i32
    %0 = arith.cmpi eq, %arg1, %c0_i32 : i32
    %1 = arith.extui %0 : i1 to i32
    %c0_i32_0 = arith.constant 0 : i32
    %2 = arith.cmpi ne, %1, %c0_i32_0 : i32
    scf.if %2 {
      %c0_15 = arith.constant 0 : index
      %c0_16 = arith.constant 0 : index
      %19 = vector.load %arg3[%c0_15, %c0_16] : memref<128x128xf32, #tpu.memory_space<vmem>>, vector<128x128xf32>
      %20 = arith.truncf %19 : vector<128x128xf32> to vector<128x128xbf16>
      %c0_17 = arith.constant 0 : index
      %c0_18 = arith.constant 0 : index
      %21 = vector.load %arg10[%c0_17, %c0_18] : memref<128x128xbf16, #tpu.memory_space<vmem>>, vector<128x128xbf16>
      tpu.vector_store %arg10[%c0_17, %c0_18], %20 {strides = array<i32>} : memref<128x128xbf16, #tpu.memory_space<vmem>>, vector<128x128xbf16>,
      %c0_19 = arith.constant 0 : index
      %c0_20 = arith.constant 0 : index
      %22 = vector.load %arg4[%c0_19, %c0_20] : memref<128x128xf32, #tpu.memory_space<vmem>>, vector<128x128xf32>
      %cst_21 = arith.constant 5.000000e-01 : f32
      %23 = vector.broadcast %cst_21 : f32 to vector<128x128xf32>
      %24 = arith.mulf %22, %23 : vector<128x128xf32>
      %25 = math.exp %24 : vector<128x128xf32>
      %26 = arith.mulf %19, %25 : vector<128x128xf32>
      %c0_22 = arith.constant 0 : index
      %c0_23 = arith.constant 0 : index
      %27 = vector.load %arg5[%c0_22, %c0_23] : memref<128x128xbf16, #tpu.memory_space<vmem>>, vector<128x128xbf16>
      %28 = arith.extf %27 : vector<128x128xbf16> to vector<128x128xf32>
      %29 = arith.mulf %26, %28 : vector<128x128xf32>
      %30 = arith.truncf %29 : vector<128x128xf32> to vector<128x128xbf16>
      %c0_24 = arith.constant 0 : index
      %c0_25 = arith.constant 0 : index
      %31 = vector.load %arg11[%c0_24, %c0_25] : memref<128x128xbf16, #tpu.memory_space<vmem>>, vector<128x128xbf16>
      tpu.vector_store %arg11[%c0_24, %c0_25], %30 {strides = array<i32>} : memref<128x128xbf16, #tpu.memory_space<vmem>>, vector<128x128xbf16>,
    } else {
    }
    %c0 = arith.constant 0 : index
    %c0_1 = arith.constant 0 : index
    %3 = vector.load %arg2[%c0, %c0_1] : memref<32x128xf32, #tpu.memory_space<vmem>>, vector<32x128xf32>
    %4 = arith.truncf %3 : vector<32x128xf32> to vector<32x128xbf16>
    %c0_2 = arith.constant 0 : index
    %c0_3 = arith.constant 0 : index
    %5 = vector.load %arg6[%c0_2, %c0_3] : memref<32x128xbf16, #tpu.memory_space<vmem>>, vector<32x128xbf16>
    %6 = arith.mulf %4, %5 : vector<32x128xbf16>
    %c0_4 = arith.constant 0 : index
    %c0_5 = arith.constant 0 : index
    %7 = vector.load %arg10[%c0_4, %c0_5] : memref<128x128xbf16, #tpu.memory_space<vmem>>, vector<128x128xbf16>
    %cst = arith.constant dense<0.000000e+00> : vector<32x128xf32>
    %8 = tpu.matmul %4, %7, %cst {dimension_numbers = #tpu.dot_dimension_numbers<[1], [1], [0], [0], [0, 0, 1, 0], [], []>} : vector<32x128xbf16>, vector<128x128xbf16>, vector<32x128xf32> -> vector<32x128xf32>
    %c0_6 = arith.constant 0 : index
    %c0_7 = arith.constant 0 : index
    %9 = vector.load %arg11[%c0_6, %c0_7] : memref<128x128xbf16, #tpu.memory_space<vmem>>, vector<128x128xbf16>
    %cst_8 = arith.constant dense<0.000000e+00> : vector<32x128xf32>
    %10 = tpu.matmul %6, %9, %cst_8 {dimension_numbers = #tpu.dot_dimension_numbers<[1], [1], [0], [0], [0, 0, 1, 0], [], []>} : vector<32x128xbf16>, vector<128x128xbf16>, vector<32x128xf32> -> vector<32x128xf32>
    %c0_9 = arith.constant 0 : index
    %c0_10 = arith.constant 0 : index
    %11 = vector.load %arg7[%c0_9, %c0_10] : memref<32x128xbf16, #tpu.memory_space<vmem>>, vector<32x128xbf16>
    %12 = arith.extf %11 : vector<32x128xbf16> to vector<32x128xf32>
    %13 = arith.mulf %10, %12 : vector<32x128xf32>
    %14 = arith.addf %8, %13 : vector<32x128xf32>
    %c0_11 = arith.constant 0 : index
    %c0_12 = arith.constant 0 : index
    %15 = vector.load %arg8[%c0_11, %c0_12] : memref<1x128xf32, #tpu.memory_space<vmem>>, vector<1x128xf32>
    %16 = vector.broadcast %15 : vector<1x128xf32> to vector<32x128xf32>
    %17 = arith.addf %14, %16 : vector<32x128xf32>
    %c0_13 = arith.constant 0 : index
    %c0_14 = arith.constant 0 : index
    %18 = vector.load %arg9[%c0_13, %c0_14] : memref<32x128xf32, #tpu.memory_space<vmem>>, vector<32x128xf32>
    tpu.vector_store %arg9[%c0_13, %c0_14], %17 {strides = array<i32>} : memref<32x128xf32, #tpu.memory_space<vmem>>, vector<32x128xf32>,
    return
  }
  func.func @transform_0(%arg0: i32, %arg1: i32) -> (i32, i32) {
    %c0_i32 = arith.constant 0 : i32
    %c0_i32_0 = arith.constant 0 : i32
    return %arg1, %c0_i32 : i32, i32
  }
  func.func @transform_1(%arg0: i32, %arg1: i32) -> (i32, i32) {
    %c0_i32 = arith.constant 0 : i32
    %c0_i32_0 = arith.constant 0 : i32
    return %arg0, %c0_i32 : i32, i32
  }
  func.func @transform_2(%arg0: i32, %arg1: i32) -> (i32, i32) {
    %c0_i32 = arith.constant 0 : i32
    %c0_i32_0 = arith.constant 0 : i32
    return %arg0, %c0_i32 : i32, i32
  }
  func.func @transform_3(%arg0: i32, %arg1: i32) -> (i32, i32) {
    %c0_i32 = arith.constant 0 : i32
    %c0_i32_0 = arith.constant 0 : i32
    return %arg0, %c0_i32 : i32, i32
  }
  func.func @transform_4(%arg0: i32, %arg1: i32) -> (i32, i32) {
    %c0_i32 = arith.constant 0 : i32
    %c0_i32_0 = arith.constant 0 : i32
    return %arg1, %c0_i32 : i32, i32
  }
  func.func @transform_5(%arg0: i32, %arg1: i32) -> (i32, i32) {
    %c0_i32 = arith.constant 0 : i32
    return %arg1, %arg0 : i32, i32
  }
  func.func @transform_6(%arg0: i32, %arg1: i32) -> (i32, i32) {
    %c0_i32 = arith.constant 0 : i32
    %c0_i32_0 = arith.constant 0 : i32
    return %c0_i32, %arg0 : i32, i32
  }
  func.func @transform_7(%arg0: i32, %arg1: i32) -> (i32, i32) {
    %c0_i32 = arith.constant 0 : i32
    return %arg1, %arg0 : i32, i32
  }
}

</mosaic_0001>

<bundles_post_ra>
// kernel: tpu_custom_call.1
= control target key start
LH: loop header
LB: loop body
LE: loop exit
PB: predicated region body
PF: predicated region fallthrough
CT: control target
= control target key end

     0   :  { %s2136_s0 = inlined_call_operand.hbm [shape: f32[32,128], index: 0, kind: input, shape index: {}]   ;;  %s2137_s1 = inlined_call_operand.hbm [shape: f32[256,128], index: 1, kind: input, shape index: {}]   ;;  %s2138_s2 = inlined_call_operand.hbm [shape: f32[256,128], index: 2, kind: input, shape index: {}]   ;;  %s2139_s3 = inlined_call_operand.hbm [shape: bf16[256,128], index: 3, kind: input, shape index: {}]   ;;  %s2140_s4 = inlined_call_operand.hbm [shape: bf16[32,128], index: 4, kind: input, shape index: {}]   ;;  %s2141_s5 = inlined_call_operand.hbm [shape: bf16[32,256], index: 5, kind: input, shape index: {}]   ;;  %s2142_s6 = inlined_call_operand.vmem [shape: f32[1,256], index: 6, kind: input, shape index: {}]   ;;  %s2143_s7 = inlined_call_operand.hbm [shape: f32[32,256], index: 7, kind: output, shape index: {}]  }
   0x1   :  { %2152 = sst [smem:[#allocation24_spill]] %s2136_s0 }
   0x2   :  { %2153 = sst [smem:[#allocation25_spill]] %s2137_s1 }
   0x3   :  { %2154 = sst [smem:[#allocation26_spill]] %s2143_s7 }
   0x4   :  { %12 = vsyncpa [#allocation5], 0 }
   0x5   :  { %13 = vsyncpa [#allocation8], 0 }
   0x6   :  { %14 = vsyncpa [#allocation11], 0 }
   0x7   :  { %15 = vsyncpa [#allocation14], 0 }
   0x8   :  { %17 = vsyncpa [#allocation14 + $0x1], 0 }
   0x9   :  { %18 = vsyncpa [#allocation6], 0 }
   0xa   :  { %20 = vsyncpa [#allocation6 + $0x1], 0  ;;  %s1819_s24 = smov 0   ;;  %s1821_s25 = smov 0  }
   0xb   :  { %s1823_s26 = smov 0   ;;  %s1825_s27 = smov 0  }
   0xc   :  { %s1827_s28 = smov 0   ;;  %s1829_s29 = smov 0  }
   0xd LB: > { %2155 = sst [smem:[#allocation22_spill]] %s1745_s24  ;;  %s2144_s30 = sadd.s32 4294967295, %s1765_s29   ;;  %s1765_s29 = sphi %s1829_s29, %s26_s29   ;;  %s1761_s28 = sphi %s1827_s28, %s2178_s28   ;;  %s1757_s27 = sphi %s1825_s27, %s2177_s27   ;;  %s1753_s26 = sphi %s1823_s26, %s2176_s26   ;;  %s1749_s25 = sphi %s1821_s25, %s2175_s25   ;;  %s1745_s24 = sphi %s1819_s24, %s2174_s24  }
   0xe   : > { %s1074_s8 = sadd.s32 4294967294, %s1765_s29   ;;  %p84_p0 = scmp.ne.s32.totalorder %s1749_s25, %s1745_s24 }
   0xf   : > { %p1855_p1 = scmp.eq.s32.totalorder %s2144_s30, 0  ;;  %p248_p2 = scmp.eq.s32.totalorder %s1074_s8, 1 }
  0x10   : > { %p1075_p4 = scmp.ge.s32.totalorder %s1765_s29, 1  ;;  %p255_p6 = scmp.lt.s32.totalorder %s1765_s29, 3 }
  0x11   : > { %p1861_p3 = por %p1855_p1, %p84_p0  ;;  %p1866_p5 = por %p248_p2, %p84_p0 }
  0x12   : > { %p1871_p7 = pnand %p1075_p4, %p255_p6  ;;  %s1160_s13 = sshll.u32 %s1757_s27, 7 }
  0x13   : > { %s2158_s11 = scalar_select %p1866_p5, 1, 0 }
  0x14   : > { %p1364_p8 = pneg %p1871_p7  ;;  %s2161_s1 = sld [smem:[#allocation25_spill]] }
  0x15   : > { %2159 = sst [smem:[#allocation23_spill]] %s2158_s11  ;;  %s1767_s18 = smov [#allocation7]  }
  0x16   : > { %s288_s19 = sshll.u32 %s1767_s18, 4  ;;  %p1886_p9 = pnand %p1364_p8, %p1861_p3  ;;  %s289_s19 = int_to_ptr.vmem [resolvable:$true] %s288_s19 }
  0x17   : > { %s1893_s23 = scalar_lea.hbm %s2138_s2, %s1160_s13  ;;  %s1162_s14 = sshll.u32 %s1757_s27, 6 }
  0x18   : > { %p1491_p12 = pneg %p1886_p9 }
  0x1a   : > { %s285_s16 = scalar_lea.hbm %s2161_s1, %s1160_s13  ;;  %s1494_s22 = scalar_lea.hbm %s2161_s1, 256 }
  0x1b   : > { %s286_s17 = sshll.u32 %s285_s16, 4  ;;  %s287_s17 = int_to_ptr.hbm [resolvable:$true] %s286_s17 }
  0x1c   : > { %s1487_s15 = sshra.s32 %s287_s17, 4  ;;  %s1488_s15 = int_to_ptr.hbm [resolvable:$true] %s1487_s15 }
  0x1d   : > { %s1489_s16 = scalar_lea.hbm %s1488_s15, 128  ;;  %p1495_p2 = scmp.lt.s32.totalorder %s1488_s15, %s2161_s1 }
  0x1e   : > { %p1490_p11 = scmp.ne.s32.totalorder %s1488_s15, %s1489_s16  ;;  %p1496_p4 = scmp.lt.s32.totalorder %s1494_s22, %s1489_s16 }
  0x20   : > { %p1492_p13 = pnand %p1491_p12, %p1490_p11  ;;  %p1497_p6 = por %p1496_p4, %p1495_p2 }
  0x22   : > { %p1493_p0 = pneg %p1492_p13 }
  0x24   : > { %p1498_p10 = pnand %p1497_p6, %p1493_p0 }
  0x26   : > { %1501 = shalt.err (!%p1498_p10)
}
  0x27   : > { %s1768_s8 = smov 128   ;;  %s1769_s11 = smov 8  }
  0x28   : > { %1370 = dma.hbm_to_vmem [thread:$0]  (!%p1886_p9), %s287_s17, 2048, %s289_s19, [#allocation8], %s1768_s8, %s1768_s8, %s1769_s11  }
  0x29   : > { %s319_s21 = scalar_lea.hbm %s2139_s3, %s1162_s14  ;;  %s1770_s30 = smov [#allocation10]  }
  0x2a   : > { %s320_s7 = sshll.u32 %s319_s21, 4  ;;  %s322_s15 = sshll.u32 %s1770_s30, 4  ;;  %s321_s7 = int_to_ptr.hbm [resolvable:$true] %s320_s7  ;;  %s323_s15 = int_to_ptr.vmem [resolvable:$true] %s322_s15 }
  0x2b   : > { %s1517_s16 = sshra.s32 %s321_s7, 4  ;;  %s1524_s17 = scalar_lea.hbm %s2139_s3, 128  ;;  %s1518_s16 = int_to_ptr.hbm [resolvable:$true] %s1517_s16 }
  0x2c   : > { %s1519_s22 = scalar_lea.hbm %s1518_s16, 64  ;;  %p1525_p0 = scmp.lt.s32.totalorder %s1518_s16, %s2139_s3 }
  0x2d   : > { %p1520_p10 = scmp.ne.s32.totalorder %s1518_s16, %s1519_s22  ;;  %p1526_p2 = scmp.lt.s32.totalorder %s1524_s17, %s1519_s22 }
  0x2f   : > { %p1522_p11 = pnand %p1520_p10, %p1491_p12  ;;  %p1527_p4 = por %p1526_p2, %p1525_p0 }
  0x31   : > { %p1523_p13 = pneg %p1522_p11 }
  0x33   : > { %p1528_p6 = pnand %p1527_p4, %p1523_p13 }
  0x35   : > { %1531 = shalt.err (!%p1528_p6)
}
  0x36   : > { %s2148_s14 = smov 64   ;;  %s2150_s18 = smov 4  }
  0x37   : > { %1376 = dma.hbm_to_vmem [thread:$0]  (!%p1886_p9), %s321_s7, 1024, %s323_s15, [#allocation11], %s2148_s14, %s2148_s14, %s2150_s18  }
  0x38   : > { %s2163_s0 = sld [smem:[#allocation24_spill]]  ;;  %s1773_s16 = smov [#allocation4]  }
  0x39   : > { %s271_s22 = sshll.u32 %s1773_s16, 4  ;;  %p1939_p10 = pnand %p1364_p8, %p1855_p1  ;;  %s272_s22 = int_to_ptr.vmem [resolvable:$true] %s271_s22 }
  0x3a   : > { %s2165_s17 = sshll.u32 %s1893_s23, 4  ;;  %s1774_s7 = smov [#allocation9]   ;;  %s304_s17 = int_to_ptr.hbm [resolvable:$true] %s2165_s17 }
  0x3b   : > { %s305_s15 = sshll.u32 %s1774_s7, 4  ;;  %s337_s1 = sshll.u32 %s2140_s4, 4  ;;  %s306_s15 = int_to_ptr.vmem [resolvable:$true] %s305_s15  ;;  %s338_s1 = int_to_ptr.hbm [resolvable:$true] %s337_s1 }
  0x3c   : > { %s1577_s21 = sshra.s32 %s304_s17, 4  ;;  %s1584_s14 = scalar_lea.hbm %s2138_s2, 256  ;;  %s1578_s21 = int_to_ptr.hbm [resolvable:$true] %s1577_s21 }
  0x3d   : > { %s1579_s16 = scalar_lea.hbm %s1578_s21, 128  ;;  %p1585_p0 = scmp.lt.s32.totalorder %s1578_s21, %s2138_s2 }
  0x3e   : > { %s269_s30 = sshll.u32 %s2163_s0, 4  ;;  %p1580_p8 = scmp.ne.s32.totalorder %s1578_s21, %s1579_s16  ;;  %s270_s30 = int_to_ptr.hbm [resolvable:$true] %s269_s30 }
  0x3f   : > { %1367 = dma.hbm_to_vmem [thread:$0]  (!%p1939_p10), %s270_s30, 512, %s272_s22, [#allocation5], %s1768_s8, %s1768_s8, %s1769_s11  }
  0x40   : > { %p1582_p11 = pnand %p1580_p8, %p1491_p12  ;;  %p1586_p2 = scmp.lt.s32.totalorder %s1584_s14, %s1579_s16 }
  0x42   : > { %p1583_p13 = pneg %p1582_p11  ;;  %p1587_p4 = por %p1586_p2, %p1585_p0 }
  0x44   : > { %p1588_p6 = pnand %p1587_p4, %p1583_p13 }
  0x46   : > { %1591 = shalt.err (!%p1588_p6)
}
  0x47   : > { %1373 = dma.hbm_to_vmem [thread:$0]  (!%p1886_p9), %s304_s17, 2048, %s306_s15, [#allocation8], %s1768_s8, %s1768_s8, %s1769_s11  }
  0x48   : > { %s1775_s0 = smov [#allocation12]   ;;  %s2166_s20 = smov 4  }
  0x49   : > { %s339_s14 = sshll.u32 %s1775_s0, 4  ;;  %s2167_s18 = smov 64   ;;  %s340_s14 = int_to_ptr.vmem [resolvable:$true] %s339_s14 }
  0x4a   : > { %1379 = dma.hbm_to_vmem [thread:$0]  (!%p1939_p10), %s338_s1, 256, %s340_s14, [#allocation11], %s2167_s18, %s2167_s18, %s2166_s20  }
  0x4b   : > { %s2168_s30 = sadd.s32 4294967295, %s1765_s29   ;;  %s38_s22 = sadd.s32 1, %s1761_s28 }
  0x4c   : > { %p242_p12 = scmp.eq.s32.totalorder %s2168_s30, 1  ;;  %p40_p8 = scmp.ge.s32.totalorder %s38_s22, 2 }
  0x4d   : > { %s71_s19 = sadd.s32 1, %s1753_s26  ;;  %p184_p11 = scmp.ne.s32.totalorder %s1753_s26, %s1749_s25 }
  0x4e   : > { %p185_p13 = scmp.eq.s32.totalorder %s1765_s29, 0  ;;  %s2180_s22 = smov (%p40_p8, %s38_s22), 0 }
  0x4f   : > { %p1981_p9 = por %p242_p12, %p184_p11  ;;  %p1390_p0 = scmp.lt.s32.totalorder %s1765_s29, 2 }
  0x50   : > { %s68_s13 = ssub.s32 %s1761_s28, %s2180_s22  ;;  %s353_s17 = sand.u32 1, %s1753_s26  }
  0x51   : > { %p69_p10 = scmp.eq.s32.totalorder %s68_s13, 0  ;;  %p186_p2 = por %p185_p13, %p184_p11 }
  0x52   : > { %s1085_s15 = sshll.u32 %s353_s17, 4  ;;  %s1086_s24 = sshll.u32 %s1761_s28, 2 }
  0x53   : > { %s1991_s1 = scalar_select %p69_p10, %s1753_s26, %s71_s19  }
  0x54   : > { %s364_s23 = scalar_lea.hbm %s2141_s5, %s1086_s24  ;;  %s357_s0 = scalar_lea.vmem [#allocation13], %s1085_s15 }
  0x55   : > { %s365_s7 = sshll.u32 %s364_s23, 4  ;;  %s367_s14 = sshll.u32 %s357_s0, 4  ;;  %s366_s7 = int_to_ptr.hbm [resolvable:$true] %s365_s7  ;;  %s368_s14 = int_to_ptr.vmem [resolvable:$true] %s367_s14 }
  0x56   : > { %p1381_p4 = pnand %p1390_p0, %p186_p2  ;;  %s354_s30 = scalar_lea.sflag [#allocation14], %s353_s17 }
  0x57   : > { %385 = sbr.rel (%p1871_p7) target bundleno = 345 (0x159), region = 48 }
  0x58   : > { %1383 = dma.hbm_to_vmem [thread:$0]  (!%p1381_p4), %s366_s7, 256, %s368_s14, %s354_s30, %s1768_s8, %s2167_s18, %s2166_s20  }
  0x5c   : > { %1720 = dma.done.wait (%p1855_p1), [#allocation5], 512  }
  0x5d   : > { %1722 = vsyncadd (%p1855_p1), [#allocation5], 4294966784 }
  0x5e   : > { %1724 = dma.done.wait (%p1861_p3), [#allocation8], 4096  }
  0x5f   : > { %1726 = vsyncadd (%p1861_p3), [#allocation8], 4294963200 }
  0x60   : > { %1728 = dma.done.wait (%p1861_p3), [#allocation11], 1024  }
  0x61   : > { %1730 = vsyncadd (%p1861_p3), [#allocation11], 4294966272 }
  0x62   : > { %1732 = dma.done.wait (%p1855_p1), [#allocation11], 256  }
  0x63   : > { %1734 = vsyncadd (%p1855_p1), [#allocation11], 4294967040  ;;  %s2020_s12 = sand.u32 1, %s1749_s25  }
  0x64   : > { %s1090_s8 = sshll.u32 %s2020_s12, 4  ;;  %s413_s20 = scalar_lea.sflag [#allocation14], %s2020_s12 }
  0x65   : > { %s2024_s18 = scalar_lea.vmem [#allocation13], %s1090_s8 }
  0x66   : > { %1736 = dma.done.wait (%p1861_p3), %s413_s20, 256  }
  0x67   : > { %1738 = vsyncadd (%p1861_p3), %s413_s20, 4294967040  ;;  %v2030_v0 = vld [vmem:[#allocation7 + $0x70] sm:$0xff]  ;;  %v2032_v1 = vld [vmem:[#allocation7 + $0x78] sm:$0xff]  ;;  %p457_p1 = scmp.lt.s32.totalorder %s1757_s27, 1  ;;  %s1091_s17 = sshll.u32 %s2020_s12, 5 }
  0x68   : > { %v527_v2 = vld [vmem:[#allocation9 + $0x70] sm:$0xff]  ;;  %v1217_v3 = vpack.c.bf16 %v2032_v1, %v2030_v0  ;;  %v528_v4 = vld [vmem:[#allocation9 + $0x78] sm:$0xff]  ;;  %v2038_v7 = vld [vmem:[#allocation7 + $0x60] sm:$0xff]  ;;  %s450_s15 = scalar_lea.vmem [#allocation15], %s1091_s17  ;;  %s1157_s24 = sshll.u32 %s1757_s27, 3 }
  0x69   : > { %v543_v5 = vmul.f32 0.5, %v527_v2  ;;  %v2036_v6 = vld [vmem:[#allocation10 + $0x38] sm:$0xff]   ;;  %v544_v8 = vmul.f32 0.5, %v528_v4  ;;  %v2040_v9 = vld [vmem:[#allocation7 + $0x68] sm:$0xff]  ;;  %v525_v10 = vld [vmem:[#allocation9 + $0x60] sm:$0xff]  ;;  %s458_s9 = scalar_select %p457_p1, %s1757_s27, 1 }
  0x6a   : > { %v526_v11 = vld [vmem:[#allocation9 + $0x68] sm:$0xff]  ;;  %1313 = vst [vmem:[#allocation2 + $0x38] sm:$0xff] %v1217_v3   ;;  %v1212_v13 = vpack.c.bf16 %v2040_v9, %v2038_v7  ;;  %v541_v14 = vmul.f32 0.5, %v525_v10  ;;  %v2044_v16 = vld [vmem:[#allocation10 + $0x30] sm:$0xff]   ;;  %v2048_v19 = vld [vmem:[#allocation7 + $0x58] sm:$0xff]  ;;  %v1249_v25 = vunpack.c.l.bf16 %v2036_v6  ;;  %v1250_v31 = vunpack.c.h.bf16 %v2036_v6  ;;  %s2170_s23 = sld [smem:[#allocation26_spill]] }
  0x6b   : > { %v573_v12 = vmul.f32 1.442695, %v543_v5  ;;  %v542_v15 = vmul.f32 0.5, %v526_v11  ;;  %v575_v17 = vmul.f32 1.442695, %v544_v8  ;;  %v2046_v18 = vld [vmem:[#allocation7 + $0x50] sm:$0xff]  ;;  %v1245_v32 = vunpack.c.l.bf16 %v2044_v16  ;;  %s459_s13 = scalar_lea.vmem %s2142_s6, %s458_s9 }
  0x6c   : > { %v523_v20 = vld [vmem:[#allocation9 + $0x50] sm:$0xff]  ;;  %1312 = vst [vmem:[#allocation2 + $0x28] sm:$0xff] %v1212_v13   ;;  %v569_v21 = vmul.f32 1.442695, %v541_v14  ;;  %v1207_v23 = vpack.c.bf16 %v2048_v19, %v2046_v18  ;;  %v524_v24 = vld [vmem:[#allocation9 + $0x58] sm:$0xff]  ;;  %v2053_v28 = vld [vmem:[#allocation10 + $0x28] sm:$0xff]   ;;  %v1246_v40 = vunpack.c.h.bf16 %v2044_v16 }
  0x6d   : > { %1455 = vpow2.f32 %v573_v12  ;;  %v571_v22 = vmul.f32 1.442695, %v542_v15  ;;  %v539_v26 = vmul.f32 0.5, %v523_v20  ;;  %v540_v27 = vmul.f32 0.5, %v524_v24  ;;  %v2055_v29 = vld [vmem:[#allocation7 + $0x40] sm:$0xff]  ;;  %v2057_v30 = vld [vmem:[#allocation7 + $0x48] sm:$0xff] }
  0x6e   : > { %1457 = vpow2.f32 %v575_v17  ;;  %1311 = vst [vmem:[#allocation2 + $0x20] sm:$0xff] %v1207_v23   ;;  %v1202_v33 = vpack.c.bf16 %v2057_v30, %v2055_v29  ;;  %v521_v34 = vld [vmem:[#allocation9 + $0x40] sm:$0xff]  ;;  %v522_v35 = vld [vmem:[#allocation9 + $0x48] sm:$0xff]  ;;  %v519_v39 = vld [vmem:[#allocation9 + $0x30] sm:$0xff]  ;;  %v1241_v41 = vunpack.c.l.bf16 %v2053_v28  ;;  %v1242_v48 = vunpack.c.h.bf16 %v2053_v28  ;;  %s916_s0 = sshll.u32 %s450_s15, 4  ;;  %s902_s27 = scalar_lea.sflag [#allocation6], %s2020_s12  ;;  %s917_s0 = int_to_ptr.vmem [resolvable:$true] %s916_s0 }
  0x6f   : > { %1459 = vpow2.f32 %v569_v21  ;;  %v565_v36 = vmul.f32 1.442695, %v539_v26  ;;  %v567_v37 = vmul.f32 1.442695, %v540_v27  ;;  %v537_v38 = vmul.f32 0.5, %v521_v34  ;;  %v2065_v43 = vld [vmem:[#allocation10 + $0x20] sm:$0xff]  }
  0x70   : > { %1461 = vpow2.f32 %v571_v22  ;;  %1310 = vst [vmem:[#allocation2 + $0x8] sm:$0xff] %v1202_v33   ;;  %v538_v42 = vmul.f32 0.5, %v522_v35  ;;  %v520_v44 = vld [vmem:[#allocation9 + $0x38] sm:$0xff]  ;;  %v535_v45 = vmul.f32 0.5, %v519_v39  ;;  %v517_v46 = vld [vmem:[#allocation9 + $0x20] sm:$0xff]  ;;  %v2068_v50 = vld [vmem:[#allocation7 + $0x30] sm:$0xff]  ;;  %v1237_v2 = vunpack.c.l.bf16 %v2065_v43  ;;  %s915_s7 = scalar_lea.hbm %s2170_s23, %s1157_s24 }
  0x71   : > { %v1170_v47 = vld [vmem:[#allocation2 + $0x38] sm:$0xff]  ;;  %1463 = vpow2.f32 %v565_v36  ;;  %v561_v49 = vmul.f32 1.442695, %v537_v38  ;;  %v536_v52 = vmul.f32 0.5, %v520_v44  ;;  %v518_v57 = vld [vmem:[#allocation9 + $0x28] sm:$0xff]  ;;  %v533_v61 = vmul.f32 0.5, %v517_v46 }
  0x72   : > { %v2070_v51 = vld [vmem:[#allocation7 + $0x38] sm:$0xff]  ;;  %1465 = vpow2.f32 %v567_v37  ;;  %v563_v54 = vmul.f32 1.442695, %v538_v42  ;;  %v557_v56 = vmul.f32 1.442695, %v535_v45  ;;  %1338 = vmatpush.bf16.xpose.msra.mxu3 %v1170_v47  ;;  %870 = vmatpush.bf16.xpose.msra.mxu1 %v1170_v47  ;;  %v1238_v3 = vunpack.c.h.bf16 %v2065_v43  ;;  %v470_v27 = vld [vmem:[#allocation7 + $0x28] sm:$0xff] }
  0x73   : > { %v1456_v53 = vpop.eup %1455  ;;  %v1197_v55 = vpack.c.bf16 %v2070_v51, %v2068_v50  ;;  %1467 = vpow2.f32 %v561_v49  ;;  %v559_v60 = vmul.f32 1.442695, %v536_v52  ;;  %v1316_v4 = vld [vmem:[#allocation10 + $0x18] sm:$0xff]   ;;  %v553_v12 = vmul.f32 1.442695, %v533_v61  ;;  %v1315_v39 = vld [vmem:[#allocation10 + $0x10] sm:$0xff]  }
  0x74   : > { %v1458_v58 = vpop.eup %1457  ;;  %v591_v59 = vmul.f32 %v1456_v53, %v2030_v0  ;;  %1469 = vpow2.f32 %v563_v54  ;;  %v534_v0 = vmul.f32 0.5, %v518_v57  ;;  %v1233_v15 = vunpack.c.l.bf16 %v1316_v4  ;;  %v516_v24 = vld [vmem:[#allocation9 + $0x18] sm:$0xff]  ;;  %v513_v57 = vld [vmem:[#allocation9] sm:$0xff]  ;;  %s918_s14 = sshll.u32 %s915_s7, 4  ;;  %s1687_s9 = scalar_lea.hbm %s2170_s23, 64  ;;  %s919_s14 = int_to_ptr.hbm [resolvable:$true] %s918_s14 }
  0x75   : > { %v1460_v62 = vpop.eup %1459  ;;  %v592_v63 = vmul.f32 %v1458_v58, %v2032_v1  ;;  %1309 = vst [vmem:[#allocation2 + $0x10] sm:$0xff] %v1197_v55   ;;  %1471 = vpow2.f32 %v557_v56  ;;  %v1169_v1 = vld [vmem:[#allocation2 + $0x28] sm:$0xff]  ;;  %v1234_v16 = vunpack.c.h.bf16 %v1316_v4  ;;  %v532_v33 = vmul.f32 0.5, %v516_v24  ;;  %v1168_v55 = vld [vmem:[#allocation2 + $0x20] sm:$0xff]  ;;  %v468_v61 = vld [vmem:[#allocation7 + $0x18] sm:$0xff]  ;;  %s1681_s30 = sshra.s32 %s919_s14, 4  ;;  %s1682_s30 = int_to_ptr.hbm [resolvable:$true] %s1681_s30 }
  0x76   : > { %v1462_v5 = vpop.eup %1461  ;;  %v639_v6 = vmul.f32 %v1249_v25, %v591_v59  ;;  %v589_v8 = vmul.f32 %v1460_v62, %v2038_v7  ;;  %1473 = vpow2.f32 %v559_v60  ;;  %v555_v17 = vmul.f32 1.442695, %v534_v0  ;;  %v515_v7 = vld [vmem:[#allocation9 + $0x10] sm:$0xff]  ;;  %v1220_v24 = vld [vmem:[#allocation10] sm:$0xff]   ;;  %s1683_s8 = scalar_lea.hbm %s1682_s30, 32  ;;  %p1688_p12 = scmp.lt.s32.totalorder %s1682_s30, %s2170_s23 }
  0x77   : > { %v640_v10 = vmul.f32 %v1250_v31, %v592_v63  ;;  %v590_v11 = vmul.f32 %v1462_v5, %v2040_v9  ;;  %v1464_v13 = vpop.eup %1463  ;;  %1475 = vpow2.f32 %v553_v12  ;;  %v469_v9 = vld [vmem:[#allocation7 + $0x20] sm:$0xff]  ;;  %v531_v31 = vmul.f32 0.5, %v515_v7  ;;  %v1314_v5 = vld [vmem:[#allocation10 + $0x8] sm:$0xff]   ;;  %p1684_p3 = scmp.ne.s32.totalorder %s1682_s30, %s1683_s8  ;;  %p1689_p8 = scmp.lt.s32.totalorder %s1687_s9, %s1683_s8 }
  0x78   : > { %v637_v14 = vmul.f32 %v1245_v32, %v589_v8  ;;  %v1466_v20 = vpop.eup %1465  ;;  %v587_v23 = vmul.f32 %v1464_v13, %v2046_v18  ;;  %1477 = vpow2.f32 %v555_v17  ;;  %v1192_v18 = vpack.c.bf16 %v470_v27, %v469_v9  ;;  %v1167_v17 = vld [vmem:[#allocation2 + $0x8] sm:$0xff] }
  0x79   : > { %v1289_v21 = vpack.c.bf16 %v640_v10, %v639_v6  ;;  %v638_v22 = vmul.f32 %v1246_v40, %v590_v11  ;;  %v1468_v25 = vpop.eup %1467  ;;  %v588_v26 = vmul.f32 %v1466_v20, %v2048_v19  ;;  %v549_v40 = vmul.f32 1.442695, %v531_v31  ;;  %p1685_p7 = pnand %p1684_p3, %p1981_p9  ;;  %p1690_p11 = por %p1689_p8, %p1688_p12 }
  0x7a   : > { %v1470_v32 = vpop.eup %1469  ;;  %v635_v35 = vmul.f32 %v1241_v41, %v587_v23  ;;  %v585_v36 = vmul.f32 %v1468_v25, %v2055_v29  ;;  %1339 = vmatpush.bf16.xpose.msra.mxu3 %v1169_v1  ;;  %871 = vmatpush.bf16.xpose.msra.mxu1 %v1169_v1  ;;  %v551_v42 = vmul.f32 1.442695, %v532_v33  ;;  %v1229_v41 = vunpack.c.l.bf16 %v1315_v39  ;;  %1308 = vst [vmem:[#allocation2 + $0x18] sm:$0xff] %v1192_v18  }
  0x7b   : > { %1327 = vst [vmem:[#allocation3 + $0x38] sm:$0xff] %v1289_v21   ;;  %v1284_v34 = vpack.c.bf16 %v638_v22, %v637_v14  ;;  %v1472_v37 = vpop.eup %1471  ;;  %v636_v19 = vmul.f32 %v1242_v48, %v588_v26  ;;  %v586_v38 = vmul.f32 %v1470_v32, %v2057_v30  ;;  %1479 = vpow2.f32 %v549_v40  ;;  %v465_v21 = vld [vmem:[#allocation7] sm:$0xff]  ;;  %v466_v22 = vld [vmem:[#allocation7 + $0x8] sm:$0xff]  ;;  %v676_v40 = vld [vmem:[#allocation4 + $0x18] sm:$0xff]  ;;  %p1686_p6 = pneg %p1685_p7 }
  0x7c   : > { %v1474_v43 = vpop.eup %1473  ;;  %v633_v44 = vmul.f32 %v1237_v2, %v585_v36  ;;  %v583_v45 = vmul.f32 %v1472_v37, %v2068_v50  ;;  %v1230_v48 = vunpack.c.h.bf16 %v1315_v39  ;;  %1481 = vpow2.f32 %v551_v42  ;;  %v514_v50 = vld [vmem:[#allocation9 + $0x8] sm:$0xff]  ;;  %v675_v39 = vld [vmem:[#allocation4 + $0x10] sm:$0xff] }
  0x7d   : > { %1326 = vst [vmem:[#allocation3 + $0x30] sm:$0xff] %v1284_v34   ;;  %v1279_v46 = vpack.c.bf16 %v636_v19, %v635_v35  ;;  %v634_v29 = vmul.f32 %v1238_v3, %v586_v38  ;;  %v584_v47 = vmul.f32 %v1474_v43, %v2070_v51  ;;  %v1476_v49 = vpop.eup %1475  ;;  %v467_v51 = vld [vmem:[#allocation7 + $0x10] sm:$0xff]  ;;  %v529_v62 = vmul.f32 0.5, %v513_v57  ;;  %v673_v43 = vld [vmem:[#allocation4] sm:$0xff]  ;;  %p1691_p13 = pnand %p1690_p11, %p1686_p6 }
  0x7e   : > { %v631_v28 = vmul.f32 %v1233_v15, %v583_v45  ;;  %v1478_v30 = vpop.eup %1477  ;;  %v581_v54 = vmul.f32 %v1476_v49, %v469_v9  ;;  %v530_v63 = vmul.f32 0.5, %v514_v50  ;;  %v1187_v3 = vpack.c.bf16 %v468_v61, %v467_v51  ;;  %v1166_v34 = vld [vmem:[#allocation2 + $0x10] sm:$0xff] }
  0x7f   : > { %1325 = vst [vmem:[#allocation3 + $0x8] sm:$0xff] %v1279_v46   ;;  %v1274_v52 = vpack.c.bf16 %v634_v29, %v633_v44  ;;  %v632_v53 = vmul.f32 %v1234_v16, %v584_v47  ;;  %v582_v56 = vmul.f32 %v1478_v30, %v470_v27  ;;  %v545_v6 = vmul.f32 1.442695, %v529_v62  ;;  %v674_v44 = vld [vmem:[#allocation4 + $0x8] sm:$0xff] }
  0x80   : > { %v629_v60 = vmul.f32 %v1229_v41, %v581_v54  ;;  %1307 = vst [vmem:[#allocation2] sm:$0xff] %v1187_v3   ;;  %v1225_v11 = vunpack.c.l.bf16 %v1314_v5  ;;  %v1226_v12 = vunpack.c.h.bf16 %v1314_v5  ;;  %v547_v1 = vmul.f32 1.442695, %v530_v63 }
  0x81   : > { %1324 = vst [vmem:[#allocation3 + $0x28] sm:$0xff] %v1274_v52   ;;  %v1269_v59 = vpack.c.bf16 %v632_v53, %v631_v28  ;;  %v630_v2 = vmul.f32 %v1230_v48, %v582_v56  ;;  %v1480_v4 = vpop.eup %1479  ;;  %1483 = vpow2.f32 %v545_v6  ;;  %v1182_v23 = vpack.c.bf16 %v466_v22, %v465_v21  ;;  %v1165_v37 = vld [vmem:[#allocation2 + $0x18] sm:$0xff]  ;;  %v1328_v56 = vld [vmem:[#allocation12 + $0x8] sm:$0xff]  }
  0x82   : > { %v1178_v58 = vld [vmem:[#allocation3 + $0x38] sm:$0xff]  ;;  %v1482_v8 = vpop.eup %1481  ;;  %1340 = vmatpush.bf16.xpose.msra.mxu3 %v1168_v55  ;;  %872 = vmatpush.bf16.xpose.msra.mxu1 %v1168_v55  ;;  %v579_v10 = vmul.f32 %v1480_v4, %v467_v51  ;;  %1485 = vpow2.f32 %v547_v1  ;;  %v1221_v26 = vunpack.c.l.bf16 %v1220_v24  ;;  %v1222_v9 = vunpack.c.h.bf16 %v1220_v24  ;;  %v1292_v55 = vld [vmem:[#allocation12] sm:$0xff]  }
  0x83   : > { %779 = vmatpush.bf16.xpose.msra.mxu0 %v1178_v58  ;;  %1330 = vmatpush.bf16.xpose.msra.mxu2 %v1178_v58  ;;  %1323 = vst [vmem:[#allocation3 + $0x20] sm:$0xff] %v1269_v59   ;;  %v1264_v0 = vpack.c.bf16 %v630_v2, %v629_v60  ;;  %v580_v13 = vmul.f32 %v1482_v8, %v468_v61  ;;  %v1293_v57 = vunpack.c.l.bf16 %v1292_v55  ;;  %v1294_v50 = vunpack.c.h.bf16 %v1292_v55 }
  0x84   : > { %v627_v14 = vmul.f32 %v1225_v11, %v579_v10  ;;  %v1177_v15 = vld [vmem:[#allocation3 + $0x30] sm:$0xff]  ;;  %1183 = vst [vmem:[#allocation2 + $0x30] sm:$0xff] %v1182_v23   ;;  %v679_v41 = vpack.c.bf16 %v675_v39, %v675_v39  ;;  %v680_v46 = vpack.c.bf16 %v676_v40, %v676_v40  ;;  %v677_v29 = vpack.c.bf16 %v673_v43, %v673_v43 }
  0x85   : > { %1322 = vst [vmem:[#allocation3 + $0x10] sm:$0xff] %v1264_v0   ;;  %v628_v16 = vmul.f32 %v1226_v12, %v580_v13  ;;  %v678_v47 = vpack.c.bf16 %v674_v44, %v674_v44  ;;  %v1297_v60 = vunpack.c.l.bf16 %v1328_v56  ;;  %v1298_v51 = vunpack.c.h.bf16 %v1328_v56  ;;  %v1300_v0 = vld [vmem:[%s2024_s18] sm:$0xff]   ;;  %v1329_v13 = vld [vmem:[%s2024_s18 + $0x8] sm:$0xff]  }
  0x86   : > { %v1176_v32 = vld [vmem:[#allocation3 + $0x8] sm:$0xff]  ;;  %v816_v49 = vunpack.c.l.b16 %v679_v41  ;;  %v817_v28 = vunpack.c.l.b16 %v680_v46  ;;  %v814_v48 = vunpack.c.l.b16 %v677_v29  ;;  %v685_v58 = vunpack.c.l.bf16 %v677_v29 }
  0x87   : > { %v1259_v20 = vpack.c.bf16 %v628_v16, %v627_v14  ;;  %v1484_v7 = vpop.eup %1483  ;;  %v1164_v38 = vld [vmem:[#allocation2] sm:$0xff]  ;;  %v815_v30 = vunpack.c.l.b16 %v678_v47  ;;  %v686_v59 = vunpack.c.l.bf16 %v678_v47  ;;  %v687_v61 = vunpack.c.l.bf16 %v679_v41 }
  0x88   : > { %v577_v25 = vmul.f32 %v1484_v7, %v465_v21  ;;  %v1486_v27 = vpop.eup %1485  ;;  %v1175_v18 = vld [vmem:[#allocation3 + $0x28] sm:$0xff]  ;;  %v819_v53 = vpack.c.b16 %v817_v28, %v816_v49  ;;  %v688_v62 = vunpack.c.l.bf16 %v680_v46  ;;  %v693_v2 = vmul.f32 %v1293_v57, %v685_v58  ;;  %v1454_v14 = vld [vmem:[%s459_s13] ss:$0 sm:$0xff] }
  0x89   : > { %1321 = vst [vmem:[#allocation3 + $0x18] sm:$0xff] %v1259_v20   ;;  %v578_v31 = vmul.f32 %v1486_v27, %v466_v22  ;;  %v818_v54 = vpack.c.b16 %v815_v30, %v814_v48  ;;  %v694_v3 = vmul.f32 %v1294_v50, %v686_v59  ;;  %v695_v4 = vmul.f32 %v1297_v60, %v687_v61 }
  0x8a   : > { %1341 = vmatpush.bf16.xpose.msra.mxu3 %v1167_v17  ;;  %873 = vmatpush.bf16.xpose.msra.mxu1 %v1167_v17  ;;  %v625_v33 = vmul.f32 %v1221_v26, %v577_v25  ;;  %v1174_v19 = vld [vmem:[#allocation3 + $0x20] sm:$0xff]  ;;  %v696_v5 = vmul.f32 %v1298_v51, %v688_v62  ;;  %v1301_v10 = vunpack.c.l.bf16 %v1300_v0  ;;  %v1305_v16 = vunpack.c.l.bf16 %v1329_v13 }
  0x8b   : > { %780 = vmatpush.bf16.xpose.msra.mxu0 %v1177_v15  ;;  %1331 = vmatpush.bf16.xpose.msra.mxu2 %v1177_v15  ;;  %v626_v35 = vmul.f32 %v1222_v9, %v578_v31  ;;  %v1163_v45 = vld [vmem:[#allocation2 + $0x30] sm:$0xff]  ;;  %v697_v6 = vpack.c.bf16 %v694_v3, %v693_v2  ;;  %v1302_v20 = vunpack.c.h.bf16 %v1300_v0  ;;  %v1306_v31 = vunpack.c.h.bf16 %v1329_v13 }
  0x8c   : > { %v1173_v42 = vld [vmem:[#allocation3 + $0x10] sm:$0xff]  ;;  %v698_v8 = vpack.c.bf16 %v696_v5, %v695_v4 }
  0x8d   : > { %v1254_v36 = vpack.c.bf16 %v626_v35, %v625_v33 }
  0x8f   : > { %1255 = vst [vmem:[#allocation3] sm:$0xff] %v1254_v36  }
  0x90   : > { %v1172_v52 = vld [vmem:[#allocation3 + $0x18] sm:$0xff] }
  0x92   : > { %1342 = vmatpush.bf16.xpose.msra.mxu3 %v1166_v34  ;;  %874 = vmatpush.bf16.xpose.msra.mxu1 %v1166_v34 }
  0x93   : > { %781 = vmatpush.bf16.xpose.msra.mxu0 %v1176_v32  ;;  %1332 = vmatpush.bf16.xpose.msra.mxu2 %v1176_v32 }
  0x96   : > { %v1171_v63 = vld [vmem:[#allocation3] sm:$0xff] }
  0x9a   : > { %1343 = vmatpush.bf16.xpose.msra.mxu3 %v1165_v37  ;;  %875 = vmatpush.bf16.xpose.msra.mxu1 %v1165_v37 }
  0x9b   : > { %782 = vmatpush.bf16.xpose.msra.mxu0 %v1175_v18  ;;  %1333 = vmatpush.bf16.xpose.msra.mxu2 %v1175_v18 }
  0xa2   : > { %1344 = vmatpush.bf16.xpose.msra.mxu3 %v1164_v38  ;;  %876 = vmatpush.bf16.xpose.msra.mxu1 %v1164_v38 }
  0xa3   : > { %783 = vmatpush.bf16.xpose.msra.mxu0 %v1174_v19  ;;  %1334 = vmatpush.bf16.xpose.msra.mxu2 %v1174_v19 }
  0xaa   : > { %1345 = vmatpush.bf16.xpose.msra.mxu3 %v1163_v45  ;;  %877 = vmatpush.bf16.xpose.msra.mxu1 %v1163_v45 }
  0xab   : > { %784 = vmatpush.bf16.xpose.msra.mxu0 %v1173_v42  ;;  %1335 = vmatpush.bf16.xpose.msra.mxu2 %v1173_v42 }
  0xb1   : > { %883 = vmatmul.bf16.vlgmr.msra.gmra.mxu3 %v819_v53  ;;  %878 = vmatmul.bf16.vlgmr.msra.gmra.mxu1 %v818_v54 }
  0xb3   : > { %785 = vmatpush.bf16.xpose.msra.mxu0 %v1172_v52  ;;  %1336 = vmatpush.bf16.xpose.msra.mxu2 %v1172_v52 }
  0xbb   : > { %786 = vmatpush.bf16.xpose.msra.mxu0 %v1171_v63  ;;  %1337 = vmatpush.bf16.xpose.msra.mxu2 %v1171_v63 }
  0xc2   : > { %787 = vmatmul.bf16.vlgmr.msra.gmra.mxu0 %v697_v6  ;;  %792 = vmatmul.bf16.vlgmr.msra.gmra.mxu2 %v698_v8 }
 0x12e   : > { %v879_v12 = vpop.f32.mrf.mxu1 }
 0x134   : > { %v884_v21 = vpop.f32.mrf.mxu3 }
 0x136   : > { %v881_v26 = vpop.f32.mrf.mxu1 }
 0x13c   : > { %v886_v35 = vpop.f32.mrf.mxu3 }
 0x13f   : > { %v788_v11 = vpop.f32.mrf.mxu0 }
 0x140   : > { %v806_v1 = vmul.f32 %v1301_v10, %v788_v11 }
 0x142   : > { %v880_v15 = vadd.f32 %v879_v12, %v806_v1 }
 0x144   : > { %v893_v17 = vadd.f32 %v1454_v14, %v880_v15 }
 0x145   : > { %v793_v22 = vpop.f32.mrf.mxu2 }
 0x146   : > { %897 = vst [vmem:[%s450_s15] sm:$0xff] %v893_v17  ;;  %v808_v23 = vmul.f32 %v1305_v16, %v793_v22 }
 0x147   : > { %v790_v7 = vpop.f32.mrf.mxu0 }
 0x148   : > { %v885_v24 = vadd.f32 %v884_v21, %v808_v23  ;;  %v807_v25 = vmul.f32 %v1302_v20, %v790_v7 }
 0x14a   : > { %v895_v9 = vadd.f32 %v1454_v14, %v885_v24  ;;  %v882_v27 = vadd.f32 %v881_v26, %v807_v25 }
 0x14c   : > { %899 = vst [vmem:[%s450_s15 + $0x10] sm:$0xff] %v895_v9  ;;  %v894_v33 = vadd.f32 %v1454_v14, %v882_v27 }
 0x14d   : > { %v795_v32 = vpop.f32.mrf.mxu2 }
 0x14e   : > { %898 = vst [vmem:[%s450_s15 + $0x8] sm:$0xff] %v894_v33  ;;  %v809_v34 = vmul.f32 %v1306_v31, %v795_v32 }
 0x150   : > { %v887_v36 = vadd.f32 %v886_v35, %v809_v34 }
 0x152   : > { %v896_v18 = vadd.f32 %v1454_v14, %v887_v36 }
 0x154   : > { %900 = vst [vmem:[%s450_s15 + $0x18] sm:$0xff] %v896_v18 }
 0x155   : > { %1694 = shalt.err (!%p1691_p13)
}
 0x156   : > { %s1776_s12 = smov 128   ;;  %s1777_s13 = smov 256  }
 0x157   : > { %s1778_s17 = smov 8  }
 0x158   : > { %1362 = dma.vmem_to_hbm [thread:$0]  (%p1981_p9), %s917_s0, 512, %s919_s14, %s902_s27, %s1776_s12, %s1777_s13, %s1778_s17  }
 0x159 PF: > { %s2171_s15 = sld [smem:[#allocation22_spill]]  ;;  %p2173_p0 = scmp.ge.s32.totalorder %s1765_s29, 2 }
 0x15b   : > { %p1385_p10 = pnand %p2173_p0, %p1866_p5 }
 0x15d   : > { %p1386_p2 = pneg %p1385_p10 }
 0x15f   : > { %s933_s21 = sand.u32 1, %s2171_s15  }
 0x160   : > { %s934_s16 = scalar_lea.sflag [#allocation6], %s933_s21 }
 0x161   : > { %1740 = dma.done.wait (%p1386_p2), %s934_s16, 512  }
 0x162   : > { %1742 = vsyncadd (%p1386_p2), %s934_s16, 4294966784  ;;  %s26_s29 = sadd.s32 1, %s1765_s29   ;;  %s2174_s24 = smov %s1749_s25 }
 0x163   : > { %p23_p4 = scmp.ge.s32.totalorder %s26_s29, 4   ;;  %s2175_s25 = smov %s1753_s26 }
 0x164   : > { %s2176_s26 = smov %s1991_s1  ;;  %s2177_s27 = smov %s1761_s28 }
 0x165   : > { %s2178_s28 = smov %s2180_s22  ;;  %25 = sbr.rel (!%p23_p4) target bundleno = 13 (0xd), region = 126 }
 0x16a   :  { %940 = vsyncpa [#allocation5], 1 }
 0x16b   :  { %942 = vsyncpa [#allocation5 + $0x1], 1 }
 0x16c   :  { %943 = vsyncpa [#allocation8], 1 }
 0x16d   :  { %944 = vsyncpa [#allocation11], 1 }
 0x16e   :  { %945 = vsyncpa [#allocation14], 1 }
 0x16f   :  { %947 = vsyncpa [#allocation14 + $0x1], 1 }
 0x170   :  { %948 = vsyncpa [#allocation6], 1 }
 0x171   :  { %950 = vsyncpa [#allocation6 + $0x1], 1 }

// kernel: tpu_custom_call.1
= control target key start
LH: loop header
LB: loop body
LE: loop exit
PB: predicated region body
PF: predicated region fallthrough
CT: control target
= control target key end

     0   :  { %s2235_s0 = inlined_call_operand.hbm [shape: f32[32,128], index: 0, kind: input, shape index: {}]   ;;  %s2236_s1 = inlined_call_operand.hbm [shape: f32[256,128], index: 1, kind: input, shape index: {}]   ;;  %s2237_s2 = inlined_call_operand.hbm [shape: f32[256,128], index: 2, kind: input, shape index: {}]   ;;  %s2238_s3 = inlined_call_operand.hbm [shape: bf16[256,128], index: 3, kind: input, shape index: {}]   ;;  %s2239_s4 = inlined_call_operand.hbm [shape: bf16[32,128], index: 4, kind: input, shape index: {}]   ;;  %s2240_s5 = inlined_call_operand.hbm [shape: bf16[32,256], index: 5, kind: input, shape index: {}]   ;;  %s2241_s6 = inlined_call_operand.vmem [shape: f32[1,256], index: 6, kind: input, shape index: {}]   ;;  %s2242_s7 = inlined_call_operand.hbm [shape: f32[32,256], index: 7, kind: output, shape index: {}]  }
   0x1   :  { %2252 = sst [smem:[#allocation27_spill]] %s2235_s0 }
   0x2   :  { %2253 = sst [smem:[#allocation28_spill]] %s2236_s1 }
   0x3   :  { %2254 = sst [smem:[#allocation29_spill]] %s2237_s2 }
   0x4   :  { %2255 = sst [smem:[#allocation30_spill]] %s2239_s4 }
   0x5   :  { %2256 = sst [smem:[#allocation31_spill]] %s2242_s7 }
   0x6   :  { %12 = vsyncpa [#allocation5], 0 }
   0x7   :  { %13 = vsyncpa [#allocation8], 0 }
   0x8   :  { %15 = vsyncpa [#allocation8 + $0x1], 0 }
   0x9   :  { %16 = vsyncpa [#allocation11], 0 }
   0xa   :  { %18 = vsyncpa [#allocation11 + $0x1], 0 }
   0xb   :  { %19 = vsyncpa [#allocation14], 0 }
   0xc   :  { %21 = vsyncpa [#allocation14 + $0x1], 0 }
   0xd   :  { %22 = vsyncpa [#allocation6], 0 }
   0xe   :  { %24 = vsyncpa [#allocation6 + $0x1], 0  ;;  %s1899_s24 = smov 0   ;;  %s1901_s25 = smov 0  }
   0xf   :  { %s1903_s26 = smov 0   ;;  %s1905_s27 = smov 0  }
  0x10   :  { %s1907_s28 = smov 0   ;;  %s1909_s29 = smov 0  }
  0x11 LB: > { %2257 = sst [smem:[#allocation22_spill]] %s1828_s24  ;;  %s1930_s30 = sadd.s32 4294967295, %s1848_s29   ;;  %s1848_s29 = sphi %s1909_s29, %s30_s29   ;;  %s1844_s28 = sphi %s1907_s28, %s2286_s28   ;;  %s1840_s27 = sphi %s1905_s27, %s2285_s27   ;;  %s1836_s26 = sphi %s1903_s26, %s2281_s26   ;;  %s1832_s25 = sphi %s1901_s25, %s2284_s25   ;;  %s1828_s24 = sphi %s1899_s24, %s2283_s24  }
  0x12   : > { %2258 = sst [smem:[#allocation23_spill]] %s1836_s26  ;;  %s1154_s8 = sadd.s32 4294967294, %s1848_s29  }
  0x13   : > { %p88_p0 = scmp.ne.s32.totalorder %s1832_s25, %s1828_s24  ;;  %p89_p1 = scmp.eq.s32.totalorder %s1930_s30, 0 }
  0x14   : > { %p246_p2 = scmp.eq.s32.totalorder %s1930_s30, 1  ;;  %p252_p3 = scmp.eq.s32.totalorder %s1154_s8, 1 }
  0x15   : > { %p1939_p4 = por %p89_p1, %p88_p0  ;;  %p1155_p5 = scmp.ge.s32.totalorder %s1848_s29, 1 }
  0x16   : > { %p1944_p6 = por %p252_p3, %p88_p0  ;;  %p259_p7 = scmp.lt.s32.totalorder %s1848_s29, 3 }
  0x17   : > { %s2262_s4 = sld [smem:[#allocation30_spill]]  ;;  %s1850_s15 = smov [#allocation12]  }
  0x18   : > { %s2260_s10 = scalar_select %p1944_p6, 1, 0 }
  0x19   : > { %p1952_p8 = pnand %p1155_p5, %p259_p7  ;;  %s292_s16 = sshll.u32 %s1850_s15, 4  ;;  %s293_s16 = int_to_ptr.vmem [resolvable:$true] %s292_s16 }
  0x1a   : > { %2261 = sst [smem:[#allocation24_spill]] %s2260_s10  ;;  %p1158_p11 = scmp.ge.s32.totalorder %s1848_s29, 2 }
  0x1b   : > { %p1450_p9 = pneg %p1952_p8  ;;  %s2243_s18 = smov 64  }
  0x1c   : > { %s2245_s19 = smov 4   ;;  %s42_s20 = sadd.s32 1, %s1844_s28 }
  0x1d   : > { %s290_s13 = sshll.u32 %s2262_s4, 4  ;;  %p1960_p10 = pnand %p1450_p9, %p89_p1  ;;  %s291_s13 = int_to_ptr.hbm [resolvable:$true] %s290_s13 }
  0x1e   : > { %p44_p12 = scmp.ge.s32.totalorder %s42_s20, 2  ;;  %s75_s21 = sadd.s32 1, %s1836_s26 }
  0x1f   : > { %1456 = dma.hbm_to_vmem [thread:$0]  (!%p1960_p10), %s291_s13, 256, %s293_s16, [#allocation11], %s2243_s18, %s2243_s18, %s2245_s19  }
  0x20   : > { %p82_p13 = scmp.ne.s32.totalorder %s1836_s26, %s1832_s25  ;;  %p83_p0 = scmp.eq.s32.totalorder %s1848_s29, 0 }
  0x21   : > { %s2288_s20 = smov (%p44_p12, %s42_s20), 0  ;;  %p1476_p9 = scmp.lt.s32.totalorder %s1848_s29, 2 }
  0x22   : > { %2265 = sst [smem:[#allocation25_spill]] %s2288_s20  ;;  %p1977_p3 = por %p83_p0, %p82_p13 }
  0x23   : > { %p1983_p5 = por %p246_p2, %p82_p13  ;;  %s72_s8 = ssub.s32 %s1844_s28, %s2288_s20 }
  0x24   : > { %p73_p7 = scmp.eq.s32.totalorder %s72_s8, 0  ;;  %s1995_s13 = sand.u32 1, %s1836_s26  }
  0x25   : > { %s1159_s15 = sshll.u32 %s1995_s13, 7  ;;  %s1246_s16 = sshll.u32 %s1844_s28, 7 }
  0x26   : > { %s1992_s12 = scalar_select %p73_p7, %s1836_s26, %s75_s21  }
  0x27   : > { %s2269_s1 = sld [smem:[#allocation28_spill]]  ;;  %s310_s24 = scalar_lea.vmem [#allocation7], %s1159_s15 }
  0x28   : > { %2268 = sst [smem:[#allocation26_spill]] %s1992_s12  ;;  %s318_s7 = sshll.u32 %s310_s24, 4  ;;  %s319_s7 = int_to_ptr.vmem [resolvable:$true] %s318_s7 }
  0x29   : > { %p2004_p2 = pnand %p1476_p9, %p1977_p3  ;;  %s2271_s2 = sld [smem:[#allocation29_spill]] }
  0x2a   : > { %s332_s12 = scalar_lea.vmem [#allocation9], %s1159_s15  ;;  %s2272_s24 = sand.u32 1, %s1848_s29  }
  0x2b   : > { %s340_s18 = sshll.u32 %s332_s12, 4  ;;  %s307_s19 = scalar_lea.sflag [#allocation8], %s2272_s24  ;;  %s341_s18 = int_to_ptr.vmem [resolvable:$true] %s340_s18 }
  0x2c   : > { %s1854_s22 = smov 8   ;;  %s2273_s0 = sld [smem:[#allocation27_spill]] }
  0x2d   : > { %s315_s4 = scalar_lea.hbm %s2269_s1, %s1246_s16  ;;  %s1853_s1 = smov 128  }
  0x2e   : > { %s316_s10 = sshll.u32 %s315_s4, 4  ;;  %s1855_s12 = smov [#allocation4]   ;;  %s317_s10 = int_to_ptr.hbm [resolvable:$true] %s316_s10 }
  0x2f   : > { %s337_s20 = scalar_lea.hbm %s2271_s2, %s1246_s16  ;;  %s1165_s15 = sshll.u32 %s1995_s13, 6 }
  0x30   : > { %s338_s4 = sshll.u32 %s337_s20, 4  ;;  %s275_s20 = sshll.u32 %s1855_s12, 4  ;;  %s339_s4 = int_to_ptr.hbm [resolvable:$true] %s338_s4  ;;  %s276_s20 = int_to_ptr.vmem [resolvable:$true] %s275_s20 }
  0x31   : > { %1460 = dma.hbm_to_vmem [thread:$0]  (!%p2004_p2), %s317_s10, 2048, %s319_s7, %s307_s19, %s1853_s1, %s1853_s1, %s1854_s22  }
  0x32   : > { %s273_s16 = sshll.u32 %s2273_s0, 4  ;;  %s1248_s7 = sshll.u32 %s1844_s28, 6  ;;  %s274_s16 = int_to_ptr.hbm [resolvable:$true] %s273_s16 }
  0x33   : > { %1453 = dma.hbm_to_vmem [thread:$0]  (!%p1960_p10), %s274_s16, 512, %s276_s20, [#allocation5], %s1853_s1, %s1853_s1, %s1854_s22  }
  0x34   : > { %1463 = dma.hbm_to_vmem [thread:$0]  (!%p2004_p2), %s339_s4, 2048, %s341_s18, %s307_s19, %s1853_s1, %s1853_s1, %s1854_s22  }
  0x35   : > { %s354_s26 = scalar_lea.vmem [#allocation10], %s1165_s15  ;;  %s359_s11 = scalar_lea.hbm %s2238_s3, %s1248_s7 }
  0x36   : > { %s362_s10 = sshll.u32 %s354_s26, 4  ;;  %s360_s12 = sshll.u32 %s359_s11, 4  ;;  %s363_s10 = int_to_ptr.vmem [resolvable:$true] %s362_s10  ;;  %s361_s12 = int_to_ptr.hbm [resolvable:$true] %s360_s12 }
  0x37   : > { %s1168_s17 = sshll.u32 %s1995_s13, 4  ;;  %s2274_s0 = sand.u32 1, %s1848_s29  }
  0x38   : > { %s351_s2 = scalar_lea.sflag [#allocation11], %s2274_s0  ;;  %s2275_s16 = smov 4  }
  0x39   : > { %s2276_s20 = smov 64   ;;  %s1169_s18 = sshll.u32 %s1844_s28, 2 }
  0x3a   : > { %1466 = dma.hbm_to_vmem [thread:$0]  (!%p2004_p2), %s361_s12, 1024, %s363_s10, %s351_s2, %s2276_s20, %s2276_s20, %s2275_s16  }
  0x3b   : > { %s383_s22 = scalar_lea.hbm %s2240_s5, %s1169_s18  ;;  %s376_s15 = scalar_lea.vmem [#allocation13], %s1168_s17 }
  0x3c   : > { %s386_s26 = sshll.u32 %s376_s15, 4  ;;  %s384_s21 = sshll.u32 %s383_s22, 4  ;;  %s387_s26 = int_to_ptr.vmem [resolvable:$true] %s386_s26  ;;  %s385_s21 = int_to_ptr.hbm [resolvable:$true] %s384_s21 }
  0x3d   : > { %s373_s7 = scalar_lea.sflag [#allocation14], %s1995_s13  ;;  %404 = sbr.rel (%p1952_p8) target bundleno = 321 (0x141), region = 48 }
  0x3e   : > { %1469 = dma.hbm_to_vmem [thread:$0]  (!%p2004_p2), %s385_s21, 256, %s387_s26, %s373_s7, %s1853_s1, %s2276_s20, %s2275_s16  }
  0x42   : > { %1803 = dma.done.wait (%p89_p1), [#allocation5], 512  }
  0x43   : > { %1805 = vsyncadd (%p89_p1), [#allocation5], 4294966784  ;;  %s411_s0 = sand.u32 1, %s1930_s30   ;;  %s2059_s2 = sand.u32 1, %s1832_s25  }
  0x44   : > { %s1172_s13 = sshll.u32 %s2059_s2, 7  ;;  %s412_s8 = scalar_lea.sflag [#allocation8], %s411_s0 }
  0x45   : > { %s2062_s10 = scalar_lea.vmem [#allocation7], %s1172_s13 }
  0x46   : > { %1807 = dma.done.wait (%p1939_p4), %s412_s8, 4096  }
  0x47   : > { %1809 = vsyncadd (%p1939_p4), %s412_s8, 4294963200  ;;  %s1174_s1 = sshll.u32 %s2059_s2, 6  ;;  %s2069_s14 = scalar_lea.vmem [#allocation9], %s1172_s13 }
  0x48   : > { %s432_s24 = scalar_lea.sflag [#allocation11], %s411_s0  ;;  %s2071_s11 = scalar_lea.vmem [#allocation10], %s1174_s1 }
  0x49   : > { %1811 = dma.done.wait (%p1939_p4), %s432_s24, 1024  }
  0x4a   : > { %1813 = vsyncadd (%p1939_p4), %s432_s24, 4294966272 }
  0x4b   : > { %1815 = dma.done.wait (%p89_p1), [#allocation11], 256  }
  0x4c   : > { %1817 = vsyncadd (%p89_p1), [#allocation11], 4294967040  ;;  %s1176_s12 = sshll.u32 %s2059_s2, 4  ;;  %s447_s17 = scalar_lea.sflag [#allocation14], %s2059_s2 }
  0x4d   : > { %s2083_s16 = scalar_lea.vmem [#allocation13], %s1176_s12 }
  0x4e   : > { %1819 = dma.done.wait (%p1939_p4), %s447_s17, 256  }
  0x4f   : > { %1821 = vsyncadd (%p1939_p4), %s447_s17, 4294967040  ;;  %v2090_v0 = vld [vmem:[%s2062_s10 + $0x70] sm:$0xff]  ;;  %v2093_v1 = vld [vmem:[%s2062_s10 + $0x78] sm:$0xff]  ;;  %p506_p1 = scmp.lt.s32.totalorder %s1840_s27, 1  ;;  %s1177_s4 = sshll.u32 %s2059_s2, 5 }
  0x50   : > { %v576_v2 = vld [vmem:[%s2069_s14 + $0x70] sm:$0xff]  ;;  %v1303_v3 = vpack.c.bf16 %v2093_v1, %v2090_v0  ;;  %v577_v4 = vld [vmem:[%s2069_s14 + $0x78] sm:$0xff]  ;;  %v2103_v7 = vld [vmem:[%s2062_s10 + $0x60] sm:$0xff]  ;;  %s499_s19 = scalar_lea.vmem [#allocation15], %s1177_s4  ;;  %s1243_s22 = sshll.u32 %s1840_s27, 3 }
  0x51   : > { %v592_v5 = vmul.f32 0.5, %v576_v2  ;;  %v2100_v6 = vld [vmem:[%s2071_s11 + $0x38] sm:$0xff]   ;;  %v593_v8 = vmul.f32 0.5, %v577_v4  ;;  %v2106_v9 = vld [vmem:[%s2062_s10 + $0x68] sm:$0xff]  ;;  %v574_v10 = vld [vmem:[%s2069_s14 + $0x60] sm:$0xff]  ;;  %s507_s30 = scalar_select %p506_p1, %s1840_s27, 1 }
  0x52   : > { %v575_v11 = vld [vmem:[%s2069_s14 + $0x68] sm:$0xff]  ;;  %1399 = vst [vmem:[#allocation2 + $0x38] sm:$0xff] %v1303_v3   ;;  %v1298_v13 = vpack.c.bf16 %v2106_v9, %v2103_v7  ;;  %v590_v14 = vmul.f32 0.5, %v574_v10  ;;  %v2113_v16 = vld [vmem:[%s2071_s11 + $0x30] sm:$0xff]   ;;  %v2119_v19 = vld [vmem:[%s2062_s10 + $0x58] sm:$0xff]  ;;  %v1335_v25 = vunpack.c.l.bf16 %v2100_v6  ;;  %v1336_v31 = vunpack.c.h.bf16 %v2100_v6  ;;  %s2277_s21 = sld [smem:[#allocation31_spill]] }
  0x53   : > { %v622_v12 = vmul.f32 1.442695, %v592_v5  ;;  %v591_v15 = vmul.f32 0.5, %v575_v11  ;;  %v624_v17 = vmul.f32 1.442695, %v593_v8  ;;  %v2116_v18 = vld [vmem:[%s2062_s10 + $0x50] sm:$0xff]  ;;  %v1331_v32 = vunpack.c.l.bf16 %v2113_v16  ;;  %s508_s18 = scalar_lea.vmem %s2241_s6, %s507_s30 }
  0x54   : > { %v572_v20 = vld [vmem:[%s2069_s14 + $0x50] sm:$0xff]  ;;  %1398 = vst [vmem:[#allocation2 + $0x28] sm:$0xff] %v1298_v13   ;;  %v618_v21 = vmul.f32 1.442695, %v590_v14  ;;  %v1293_v23 = vpack.c.bf16 %v2119_v19, %v2116_v18  ;;  %v573_v24 = vld [vmem:[%s2069_s14 + $0x58] sm:$0xff]  ;;  %v2127_v28 = vld [vmem:[%s2071_s11 + $0x28] sm:$0xff]   ;;  %v1332_v40 = vunpack.c.h.bf16 %v2113_v16 }
  0x55   : > { %1538 = vpow2.f32 %v622_v12  ;;  %v620_v22 = vmul.f32 1.442695, %v591_v15  ;;  %v588_v26 = vmul.f32 0.5, %v572_v20  ;;  %v589_v27 = vmul.f32 0.5, %v573_v24  ;;  %v2130_v29 = vld [vmem:[%s2062_s10 + $0x40] sm:$0xff]  ;;  %v2133_v30 = vld [vmem:[%s2062_s10 + $0x48] sm:$0xff] }
  0x56   : > { %1540 = vpow2.f32 %v624_v17  ;;  %1397 = vst [vmem:[#allocation2 + $0x20] sm:$0xff] %v1293_v23   ;;  %v1288_v33 = vpack.c.bf16 %v2133_v30, %v2130_v29  ;;  %v570_v34 = vld [vmem:[%s2069_s14 + $0x40] sm:$0xff]  ;;  %v571_v35 = vld [vmem:[%s2069_s14 + $0x48] sm:$0xff]  ;;  %v568_v39 = vld [vmem:[%s2069_s14 + $0x30] sm:$0xff]  ;;  %v1327_v41 = vunpack.c.l.bf16 %v2127_v28  ;;  %v1328_v48 = vunpack.c.h.bf16 %v2127_v28  ;;  %s965_s0 = sshll.u32 %s499_s19, 4  ;;  %s951_s27 = scalar_lea.sflag [#allocation6], %s2059_s2  ;;  %s966_s0 = int_to_ptr.vmem [resolvable:$true] %s965_s0 }
  0x57   : > { %1542 = vpow2.f32 %v618_v21  ;;  %v614_v36 = vmul.f32 1.442695, %v588_v26  ;;  %v616_v37 = vmul.f32 1.442695, %v589_v27  ;;  %v586_v38 = vmul.f32 0.5, %v570_v34  ;;  %v2145_v43 = vld [vmem:[%s2071_s11 + $0x20] sm:$0xff]  }
  0x58   : > { %1544 = vpow2.f32 %v620_v22  ;;  %1396 = vst [vmem:[#allocation2 + $0x8] sm:$0xff] %v1288_v33   ;;  %v587_v42 = vmul.f32 0.5, %v571_v35  ;;  %v569_v44 = vld [vmem:[%s2069_s14 + $0x38] sm:$0xff]  ;;  %v584_v45 = vmul.f32 0.5, %v568_v39  ;;  %v566_v46 = vld [vmem:[%s2069_s14 + $0x20] sm:$0xff]  ;;  %v2151_v50 = vld [vmem:[%s2062_s10 + $0x30] sm:$0xff]  ;;  %v1323_v2 = vunpack.c.l.bf16 %v2145_v43  ;;  %s964_s7 = scalar_lea.hbm %s2277_s21, %s1243_s22 }
  0x59   : > { %v1256_v47 = vld [vmem:[#allocation2 + $0x38] sm:$0xff]  ;;  %1546 = vpow2.f32 %v614_v36  ;;  %v610_v49 = vmul.f32 1.442695, %v586_v38  ;;  %v585_v52 = vmul.f32 0.5, %v569_v44  ;;  %v567_v57 = vld [vmem:[%s2069_s14 + $0x28] sm:$0xff]  ;;  %v582_v61 = vmul.f32 0.5, %v566_v46 }
  0x5a   : > { %v2154_v51 = vld [vmem:[%s2062_s10 + $0x38] sm:$0xff]  ;;  %1548 = vpow2.f32 %v616_v37  ;;  %v612_v54 = vmul.f32 1.442695, %v587_v42  ;;  %v606_v56 = vmul.f32 1.442695, %v584_v45  ;;  %1424 = vmatpush.bf16.xpose.msra.mxu3 %v1256_v47  ;;  %919 = vmatpush.bf16.xpose.msra.mxu1 %v1256_v47  ;;  %v1324_v3 = vunpack.c.h.bf16 %v2145_v43  ;;  %v564_v23 = vld [vmem:[%s2069_s14 + $0x10] sm:$0xff] }
  0x5b   : > { %v1539_v53 = vpop.eup %1538  ;;  %v1283_v55 = vpack.c.bf16 %v2154_v51, %v2151_v50  ;;  %1550 = vpow2.f32 %v610_v49  ;;  %v608_v60 = vmul.f32 1.442695, %v585_v52  ;;  %v1402_v4 = vld [vmem:[%s2071_s11 + $0x18] sm:$0xff]   ;;  %v1255_v13 = vld [vmem:[#allocation2 + $0x28] sm:$0xff]  ;;  %v518_v26 = vld [vmem:[%s2062_s10 + $0x20] sm:$0xff]  ;;  %s967_s13 = sshll.u32 %s964_s7, 4  ;;  %s968_s13 = int_to_ptr.hbm [resolvable:$true] %s967_s13 }
  0x5c   : > { %v1541_v58 = vpop.eup %1540  ;;  %v640_v59 = vmul.f32 %v1539_v53, %v2090_v0  ;;  %1552 = vpow2.f32 %v612_v54  ;;  %v583_v0 = vmul.f32 0.5, %v567_v57  ;;  %v1319_v15 = vunpack.c.l.bf16 %v1402_v4  ;;  %v565_v24 = vld [vmem:[%s2069_s14 + $0x18] sm:$0xff]  ;;  %v519_v27 = vld [vmem:[%s2062_s10 + $0x28] sm:$0xff]  ;;  %v1401_v39 = vld [vmem:[%s2071_s11 + $0x10] sm:$0xff]   ;;  %s1764_s8 = sshra.s32 %s968_s13, 4  ;;  %s1770_s24 = scalar_lea.hbm %s2277_s21, 64  ;;  %s1765_s8 = int_to_ptr.hbm [resolvable:$true] %s1764_s8 }
  0x5d   : > { %v1543_v62 = vpop.eup %1542  ;;  %v641_v63 = vmul.f32 %v1541_v58, %v2093_v1  ;;  %1395 = vst [vmem:[#allocation2 + $0x10] sm:$0xff] %v1283_v55   ;;  %1554 = vpow2.f32 %v606_v56  ;;  %v602_v1 = vmul.f32 1.442695, %v582_v61  ;;  %v1320_v16 = vunpack.c.h.bf16 %v1402_v4  ;;  %v1254_v54 = vld [vmem:[#allocation2 + $0x20] sm:$0xff]  ;;  %v563_v57 = vld [vmem:[%s2069_s14 + $0x8] sm:$0xff]  ;;  %v517_v61 = vld [vmem:[%s2062_s10 + $0x18] sm:$0xff]  ;;  %p1771_p12 = scmp.lt.s32.totalorder %s1765_s8, %s2277_s21 }
  0x5e   : > { %v1545_v5 = vpop.eup %1544  ;;  %v688_v6 = vmul.f32 %v1335_v25, %v640_v59  ;;  %v638_v8 = vmul.f32 %v1543_v62, %v2103_v7  ;;  %1556 = vpow2.f32 %v608_v60  ;;  %v604_v17 = vmul.f32 1.442695, %v583_v0  ;;  %v562_v56 = vld [vmem:[%s2069_s14] sm:$0xff]  ;;  %v516_v60 = vld [vmem:[%s2062_s10 + $0x10] sm:$0xff] }
  0x5f   : > { %v689_v10 = vmul.f32 %v1336_v31, %v641_v63  ;;  %v639_v11 = vmul.f32 %v1545_v5, %v2106_v9  ;;  %v1547_v12 = vpop.eup %1546  ;;  %1558 = vpow2.f32 %v602_v1  ;;  %v580_v31 = vmul.f32 0.5, %v564_v23  ;;  %v1400_v5 = vld [vmem:[%s2071_s11 + $0x8] sm:$0xff]  }
  0x60   : > { %v686_v14 = vmul.f32 %v1331_v32, %v638_v8  ;;  %v1549_v20 = vpop.eup %1548  ;;  %v636_v22 = vmul.f32 %v1547_v12, %v2116_v18  ;;  %1560 = vpow2.f32 %v604_v17  ;;  %v581_v32 = vmul.f32 0.5, %v565_v24  ;;  %v1253_v17 = vld [vmem:[#allocation2 + $0x8] sm:$0xff]  ;;  %v1306_v24 = vld [vmem:[%s2071_s11] sm:$0xff]  }
  0x61   : > { %v1375_v21 = vpack.c.bf16 %v689_v10, %v688_v6  ;;  %v687_v7 = vmul.f32 %v1332_v40, %v639_v11  ;;  %v1551_v25 = vpop.eup %1550  ;;  %v637_v9 = vmul.f32 %v1549_v20, %v2119_v19  ;;  %v1278_v36 = vpack.c.bf16 %v519_v27, %v518_v26 }
  0x62   : > { %v1553_v33 = vpop.eup %1552  ;;  %v684_v35 = vmul.f32 %v1327_v41, %v636_v22  ;;  %v634_v18 = vmul.f32 %v1551_v25, %v2130_v29  ;;  %1425 = vmatpush.bf16.xpose.msra.mxu3 %v1255_v13  ;;  %920 = vmatpush.bf16.xpose.msra.mxu1 %v1255_v13  ;;  %v598_v40 = vmul.f32 1.442695, %v580_v31  ;;  %v600_v42 = vmul.f32 1.442695, %v581_v32 }
  0x63   : > { %1413 = vst [vmem:[#allocation3 + $0x38] sm:$0xff] %v1375_v21   ;;  %v1370_v34 = vpack.c.bf16 %v687_v7, %v686_v14  ;;  %v1555_v37 = vpop.eup %1554  ;;  %v685_v19 = vmul.f32 %v1328_v48, %v637_v9  ;;  %v635_v38 = vmul.f32 %v1553_v33, %v2133_v30  ;;  %v1315_v41 = vunpack.c.l.bf16 %v1401_v39  ;;  %v514_v21 = vld [vmem:[%s2062_s10] sm:$0xff]  ;;  %v515_v7 = vld [vmem:[%s2062_s10 + $0x8] sm:$0xff]  ;;  %s1766_s10 = scalar_lea.hbm %s1765_s8, 32 }
  0x64   : > { %v1557_v43 = vpop.eup %1556  ;;  %v682_v44 = vmul.f32 %v1323_v2, %v634_v18  ;;  %v632_v45 = vmul.f32 %v1555_v37, %v2151_v50  ;;  %1394 = vst [vmem:[#allocation2 + $0x18] sm:$0xff] %v1278_v36   ;;  %1562 = vpow2.f32 %v598_v40  ;;  %v1316_v30 = vunpack.c.h.bf16 %v1401_v39  ;;  %v724_v39 = vld [vmem:[#allocation4 + $0x10] sm:$0xff]  ;;  %v725_v40 = vld [vmem:[#allocation4 + $0x18] sm:$0xff]  ;;  %p1767_p4 = scmp.ne.s32.totalorder %s1765_s8, %s1766_s10  ;;  %p1772_p13 = scmp.lt.s32.totalorder %s1770_s24, %s1766_s10 }
  0x65   : > { %1412 = vst [vmem:[#allocation3 + $0x30] sm:$0xff] %v1370_v34   ;;  %v1365_v46 = vpack.c.bf16 %v685_v19, %v684_v35  ;;  %v683_v29 = vmul.f32 %v1324_v3, %v635_v38  ;;  %v633_v47 = vmul.f32 %v1557_v43, %v2154_v51  ;;  %v1559_v28 = vpop.eup %1558  ;;  %1564 = vpow2.f32 %v600_v42  ;;  %v1252_v34 = vld [vmem:[#allocation2 + $0x10] sm:$0xff]  ;;  %v722_v43 = vld [vmem:[#allocation4] sm:$0xff] }
  0x66   : > { %v680_v48 = vmul.f32 %v1319_v15, %v632_v45  ;;  %v1561_v49 = vpop.eup %1560  ;;  %v630_v50 = vmul.f32 %v1559_v28, %v518_v26  ;;  %v578_v62 = vmul.f32 0.5, %v562_v56  ;;  %v579_v63 = vmul.f32 0.5, %v563_v57  ;;  %p1768_p8 = pnand %p1767_p4, %p1983_p5  ;;  %p1773_p0 = por %p1772_p13, %p1771_p12 }
  0x67   : > { %1411 = vst [vmem:[#allocation3 + $0x8] sm:$0xff] %v1365_v46   ;;  %v1360_v52 = vpack.c.bf16 %v683_v29, %v682_v44  ;;  %v681_v53 = vmul.f32 %v1320_v16, %v633_v47  ;;  %v631_v55 = vmul.f32 %v1561_v49, %v519_v27  ;;  %v1273_v3 = vpack.c.bf16 %v517_v61, %v516_v60  ;;  %v723_v44 = vld [vmem:[#allocation4 + $0x8] sm:$0xff] }
  0x68   : > { %v678_v59 = vmul.f32 %v1315_v41, %v630_v50  ;;  %v594_v6 = vmul.f32 1.442695, %v578_v62  ;;  %v1311_v11 = vunpack.c.l.bf16 %v1400_v5  ;;  %v1312_v1 = vunpack.c.h.bf16 %v1400_v5  ;;  %p1769_p10 = pneg %p1768_p8 }
  0x69   : > { %1410 = vst [vmem:[#allocation3 + $0x28] sm:$0xff] %v1360_v52   ;;  %v1355_v51 = vpack.c.bf16 %v681_v53, %v680_v48  ;;  %v679_v2 = vmul.f32 %v1316_v30, %v631_v55  ;;  %v596_v13 = vmul.f32 1.442695, %v579_v63  ;;  %v1268_v22 = vpack.c.bf16 %v515_v7, %v514_v21  ;;  %v1414_v55 = vld [vmem:[#allocation12 + $0x8] sm:$0xff]  }
  0x6a   : > { %v1264_v58 = vld [vmem:[#allocation3 + $0x38] sm:$0xff]  ;;  %v1563_v4 = vpop.eup %1562  ;;  %1426 = vmatpush.bf16.xpose.msra.mxu3 %v1254_v54  ;;  %921 = vmatpush.bf16.xpose.msra.mxu1 %v1254_v54  ;;  %1393 = vst [vmem:[#allocation2] sm:$0xff] %v1273_v3   ;;  %1566 = vpow2.f32 %v594_v6  ;;  %v1307_v9 = vunpack.c.l.bf16 %v1306_v24  ;;  %v1308_v26 = vunpack.c.h.bf16 %v1306_v24  ;;  %v728_v41 = vpack.c.bf16 %v724_v39, %v724_v39  ;;  %v1378_v54 = vld [vmem:[#allocation12] sm:$0xff]   ;;  %p1774_p3 = pnand %p1773_p0, %p1769_p10 }
  0x6b   : > { %828 = vmatpush.bf16.xpose.msra.mxu0 %v1264_v58  ;;  %1416 = vmatpush.bf16.xpose.msra.mxu2 %v1264_v58  ;;  %1409 = vst [vmem:[#allocation3 + $0x20] sm:$0xff] %v1355_v51   ;;  %v1565_v8 = vpop.eup %1564  ;;  %v1350_v0 = vpack.c.bf16 %v679_v2, %v678_v59  ;;  %v628_v10 = vmul.f32 %v1563_v4, %v516_v60  ;;  %1568 = vpow2.f32 %v596_v13  ;;  %v1251_v37 = vld [vmem:[#allocation2 + $0x18] sm:$0xff]  ;;  %v1379_v56 = vunpack.c.l.bf16 %v1378_v54 }
  0x6c   : > { %v629_v12 = vmul.f32 %v1565_v8, %v517_v61  ;;  %v1263_v15 = vld [vmem:[#allocation3 + $0x30] sm:$0xff]  ;;  %1269 = vst [vmem:[#allocation2 + $0x30] sm:$0xff] %v1268_v22   ;;  %v729_v46 = vpack.c.bf16 %v725_v40, %v725_v40  ;;  %v726_v29 = vpack.c.bf16 %v722_v43, %v722_v43  ;;  %v727_v47 = vpack.c.bf16 %v723_v44, %v723_v44 }
  0x6d   : > { %1408 = vst [vmem:[#allocation3 + $0x10] sm:$0xff] %v1350_v0   ;;  %v676_v14 = vmul.f32 %v1311_v11, %v628_v10  ;;  %v865_v28 = vunpack.c.l.b16 %v728_v41  ;;  %v1380_v57 = vunpack.c.h.bf16 %v1378_v54  ;;  %v1383_v59 = vunpack.c.l.bf16 %v1414_v55  ;;  %v1386_v0 = vld [vmem:[%s2083_s16] sm:$0xff]  }
  0x6e   : > { %v677_v16 = vmul.f32 %v1312_v1, %v629_v12  ;;  %v1262_v33 = vld [vmem:[#allocation3 + $0x8] sm:$0xff]  ;;  %v866_v48 = vunpack.c.l.b16 %v729_v46  ;;  %v863_v30 = vunpack.c.l.b16 %v726_v29  ;;  %v864_v49 = vunpack.c.l.b16 %v727_v47 }
  0x6f   : > { %v734_v58 = vunpack.c.l.bf16 %v726_v29  ;;  %v735_v51 = vunpack.c.l.bf16 %v727_v47  ;;  %v1384_v60 = vunpack.c.h.bf16 %v1414_v55  ;;  %v736_v61 = vunpack.c.l.bf16 %v728_v41  ;;  %v1415_v12 = vld [vmem:[%s2083_s16 + $0x8] sm:$0xff]  }
  0x70   : > { %v1345_v20 = vpack.c.bf16 %v677_v16, %v676_v14  ;;  %v1567_v23 = vpop.eup %1566  ;;  %v1261_v36 = vld [vmem:[#allocation3 + $0x28] sm:$0xff]  ;;  %v868_v53 = vpack.c.b16 %v866_v48, %v865_v28  ;;  %v867_v50 = vpack.c.b16 %v864_v49, %v863_v30  ;;  %v737_v62 = vunpack.c.l.bf16 %v729_v46  ;;  %v1537_v14 = vld [vmem:[%s508_s18] ss:$0 sm:$0xff] }
  0x71   : > { %v626_v25 = vmul.f32 %v1567_v23, %v514_v21  ;;  %v1569_v27 = vpop.eup %1568  ;;  %v1250_v38 = vld [vmem:[#allocation2] sm:$0xff]  ;;  %v742_v2 = vmul.f32 %v1379_v56, %v734_v58  ;;  %v743_v3 = vmul.f32 %v1380_v57, %v735_v51  ;;  %v744_v4 = vmul.f32 %v1383_v59, %v736_v61 }
  0x72   : > { %1407 = vst [vmem:[#allocation3 + $0x18] sm:$0xff] %v1345_v20   ;;  %1427 = vmatpush.bf16.xpose.msra.mxu3 %v1253_v17  ;;  %922 = vmatpush.bf16.xpose.msra.mxu1 %v1253_v17  ;;  %v627_v31 = vmul.f32 %v1569_v27, %v515_v7  ;;  %v1260_v19 = vld [vmem:[#allocation3 + $0x20] sm:$0xff]  ;;  %v745_v5 = vmul.f32 %v1384_v60, %v737_v62  ;;  %v1387_v10 = vunpack.c.l.bf16 %v1386_v0  ;;  %v1391_v16 = vunpack.c.l.bf16 %v1415_v12 }
  0x73   : > { %829 = vmatpush.bf16.xpose.msra.mxu0 %v1263_v15  ;;  %1417 = vmatpush.bf16.xpose.msra.mxu2 %v1263_v15  ;;  %v674_v32 = vmul.f32 %v1307_v9, %v626_v25  ;;  %v1249_v45 = vld [vmem:[#allocation2 + $0x30] sm:$0xff]  ;;  %v746_v6 = vpack.c.bf16 %v743_v3, %v742_v2  ;;  %v1388_v20 = vunpack.c.h.bf16 %v1386_v0 }
  0x74   : > { %v675_v35 = vmul.f32 %v1308_v26, %v627_v31  ;;  %v1259_v42 = vld [vmem:[#allocation3 + $0x10] sm:$0xff]  ;;  %v747_v8 = vpack.c.bf16 %v745_v5, %v744_v4  ;;  %v1392_v31 = vunpack.c.h.bf16 %v1415_v12 }
  0x76   : > { %v1340_v18 = vpack.c.bf16 %v675_v35, %v674_v32 }
  0x78   : > { %1341 = vst [vmem:[#allocation3] sm:$0xff] %v1340_v18  }
  0x79   : > { %v1258_v52 = vld [vmem:[#allocation3 + $0x18] sm:$0xff] }
  0x7a   : > { %1428 = vmatpush.bf16.xpose.msra.mxu3 %v1252_v34  ;;  %923 = vmatpush.bf16.xpose.msra.mxu1 %v1252_v34 }
  0x7b   : > { %830 = vmatpush.bf16.xpose.msra.mxu0 %v1262_v33  ;;  %1418 = vmatpush.bf16.xpose.msra.mxu2 %v1262_v33 }
  0x7f   : > { %v1257_v63 = vld [vmem:[#allocation3] sm:$0xff] }
  0x82   : > { %1429 = vmatpush.bf16.xpose.msra.mxu3 %v1251_v37  ;;  %924 = vmatpush.bf16.xpose.msra.mxu1 %v1251_v37 }
  0x83   : > { %831 = vmatpush.bf16.xpose.msra.mxu0 %v1261_v36  ;;  %1419 = vmatpush.bf16.xpose.msra.mxu2 %v1261_v36 }
  0x8a   : > { %1430 = vmatpush.bf16.xpose.msra.mxu3 %v1250_v38  ;;  %925 = vmatpush.bf16.xpose.msra.mxu1 %v1250_v38 }
  0x8b   : > { %832 = vmatpush.bf16.xpose.msra.mxu0 %v1260_v19  ;;  %1420 = vmatpush.bf16.xpose.msra.mxu2 %v1260_v19 }
  0x92   : > { %1431 = vmatpush.bf16.xpose.msra.mxu3 %v1249_v45  ;;  %926 = vmatpush.bf16.xpose.msra.mxu1 %v1249_v45 }
  0x93   : > { %833 = vmatpush.bf16.xpose.msra.mxu0 %v1259_v42  ;;  %1421 = vmatpush.bf16.xpose.msra.mxu2 %v1259_v42 }
  0x99   : > { %932 = vmatmul.bf16.vlgmr.msra.gmra.mxu3 %v868_v53  ;;  %927 = vmatmul.bf16.vlgmr.msra.gmra.mxu1 %v867_v50 }
  0x9b   : > { %834 = vmatpush.bf16.xpose.msra.mxu0 %v1258_v52  ;;  %1422 = vmatpush.bf16.xpose.msra.mxu2 %v1258_v52 }
  0xa3   : > { %835 = vmatpush.bf16.xpose.msra.mxu0 %v1257_v63  ;;  %1423 = vmatpush.bf16.xpose.msra.mxu2 %v1257_v63 }
  0xaa   : > { %836 = vmatmul.bf16.vlgmr.msra.gmra.mxu0 %v746_v6  ;;  %841 = vmatmul.bf16.vlgmr.msra.gmra.mxu2 %v747_v8 }
 0x116   : > { %v928_v1 = vpop.f32.mrf.mxu1 }
 0x11c   : > { %v933_v21 = vpop.f32.mrf.mxu3 }
 0x11e   : > { %v930_v9 = vpop.f32.mrf.mxu1 }
 0x124   : > { %v935_v35 = vpop.f32.mrf.mxu3 }
 0x127   : > { %v837_v11 = vpop.f32.mrf.mxu0 }
 0x128   : > { %v855_v13 = vmul.f32 %v1387_v10, %v837_v11 }
 0x12a   : > { %v929_v15 = vadd.f32 %v928_v1, %v855_v13 }
 0x12c   : > { %v942_v17 = vadd.f32 %v1537_v14, %v929_v15 }
 0x12d   : > { %v842_v7 = vpop.f32.mrf.mxu2 }
 0x12e   : > { %946 = vst [vmem:[%s499_s19] sm:$0xff] %v942_v17  ;;  %v857_v22 = vmul.f32 %v1391_v16, %v842_v7 }
 0x12f   : > { %v839_v23 = vpop.f32.mrf.mxu0 }
 0x130   : > { %v934_v24 = vadd.f32 %v933_v21, %v857_v22  ;;  %v856_v25 = vmul.f32 %v1388_v20, %v839_v23 }
 0x132   : > { %v944_v26 = vadd.f32 %v1537_v14, %v934_v24  ;;  %v931_v27 = vadd.f32 %v930_v9, %v856_v25 }
 0x134   : > { %948 = vst [vmem:[%s499_s19 + $0x10] sm:$0xff] %v944_v26  ;;  %v943_v32 = vadd.f32 %v1537_v14, %v931_v27 }
 0x135   : > { %v844_v33 = vpop.f32.mrf.mxu2 }
 0x136   : > { %947 = vst [vmem:[%s499_s19 + $0x8] sm:$0xff] %v943_v32  ;;  %v858_v34 = vmul.f32 %v1392_v31, %v844_v33 }
 0x138   : > { %v936_v18 = vadd.f32 %v935_v35, %v858_v34 }
 0x13a   : > { %v945_v36 = vadd.f32 %v1537_v14, %v936_v18 }
 0x13c   : > { %949 = vst [vmem:[%s499_s19 + $0x18] sm:$0xff] %v945_v36 }
 0x13d   : > { %1777 = shalt.err (!%p1774_p3)
}
 0x13e   : > { %s1856_s2 = smov 128   ;;  %s1857_s17 = smov 256  }
 0x13f   : > { %s1858_s16 = smov 8  }
 0x140   : > { %1448 = dma.vmem_to_hbm [thread:$0]  (%p1983_p5), %s966_s0, 512, %s968_s13, %s951_s27, %s1856_s2, %s1857_s17, %s1858_s16  }
 0x141 PF: > { %s2278_s30 = sld [smem:[#allocation22_spill]]  ;;  %p1471_p7 = pnand %p1158_p11, %p1944_p6 }
 0x143   : > { %p1472_p9 = pneg %p1471_p7 }
 0x147   : > { %s982_s20 = sand.u32 1, %s2278_s30  }
 0x148   : > { %s983_s18 = scalar_lea.sflag [#allocation6], %s982_s20 }
 0x149   : > { %1823 = dma.done.wait (%p1472_p9), %s983_s18, 512  }
 0x14a   : > { %1825 = vsyncadd (%p1472_p9), %s983_s18, 4294966784  ;;  %s30_s29 = sadd.s32 1, %s1848_s29   ;;  %s2280_s4 = sld [smem:[#allocation23_spill]] }
 0x14b   : > { %p27_p2 = scmp.ge.s32.totalorder %s30_s29, 4   ;;  %s2281_s26 = sld [smem:[#allocation26_spill]] }
 0x14c   : > { %s2282_s23 = sld [smem:[#allocation25_spill]]  ;;  %s2283_s24 = smov %s1832_s25 }
 0x14d   : > { %s2285_s27 = smov %s1844_s28 }
 0x14e   :  { %29 = sbr.rel (!%p27_p2) target bundleno = 17 (0x11), region = 148 }
 0x150   : > { %s2284_s25 = smov %s2280_s4 }
 0x152   : > { %s2286_s28 = smov %s2282_s23 }
 0x153   :  { %989 = vsyncpa [#allocation5], 1 }
 0x154   :  { %991 = vsyncpa [#allocation5 + $0x1], 1 }
 0x155   :  { %992 = vsyncpa [#allocation8], 1 }
 0x156   :  { %994 = vsyncpa [#allocation8 + $0x1], 1 }
 0x157   :  { %995 = vsyncpa [#allocation11], 1 }
 0x158   :  { %997 = vsyncpa [#allocation11 + $0x1], 1 }
 0x159   :  { %998 = vsyncpa [#allocation14], 1 }
 0x15a   :  { %1000 = vsyncpa [#allocation14 + $0x1], 1 }
 0x15b   :  { %1001 = vsyncpa [#allocation6], 1 }
 0x15c   :  { %1003 = vsyncpa [#allocation6 + $0x1], 1 }

</bundles_post_ra>
